<compile_context>
chip_gen: v6e
topology: v6e:2x2x1
jax: 0.10.0
libtpu: 0.0.40
codegen_flags: <defaults>
</compile_context>

<pallas_src>
import jax
import jax.numpy as jnp
from jax.experimental import pallas as pl
from jax.experimental.pallas import tpu as pltpu

LANE = 128


def _acw_kernel(rgb_ref, dep_ref,
                w1r_ref, w1d_ref, b1_ref,
                w2_ref, b2_ref,
                w3r_ref, w3d_ref, b3_ref,
                o_ref):
    # rgb_ref / dep_ref: (C, TS) tiles -- channels on sublanes, spatial on lanes.
    C = rgb_ref.shape[0]
    f32 = jnp.float32

    # Excitation hidden layer: (R, TS) = W1_rgb @ rgb + W1_dep @ dep + b1, ReLU.
    h = (jnp.dot(w1r_ref[...], rgb_ref[...].astype(f32), preferred_element_type=f32)
         + jnp.dot(w1d_ref[...], dep_ref[...].astype(f32), preferred_element_type=f32)
         + b1_ref[...])
    h = jnp.maximum(h, 0.0)

    # Channel weighting: (2C, TS) = sigmoid(W2 @ h + b2).
    wgt = jax.nn.sigmoid(
        jnp.dot(w2_ref[...], h, preferred_element_type=f32) + b2_ref[...])

    # Re-read the (VMEM-resident) input tiles here instead of keeping them live
    # across the matmuls + sigmoid: cheap vld, lower vreg / scratch pressure.
    y_rgb = rgb_ref[...].astype(f32) * wgt[:C, :]
    y_dep = dep_ref[...].astype(f32) * wgt[C:, :]

    # Output 1x1 conv: (Cout, TS) = W3_rgb @ y_rgb + W3_dep @ y_dep + b3.
    out = (jnp.dot(w3r_ref[...], y_rgb, preferred_element_type=f32)
           + jnp.dot(w3d_ref[...], y_dep, preferred_element_type=f32)
           + b3_ref[...])
    o_ref[...] = out.astype(o_ref.dtype)


def _vmem_limit_bytes():
    """Generation-aware scoped-VMEM limit (leave headroom for Mosaic scratch)."""
    cap = 64 * 1024 * 1024          # conservative default (v7x per-core VMEM)
    try:
        info = pltpu.get_tpu_info()
        cap = int(getattr(info, "vmem_capacity_bytes", cap))
    except Exception:
        pass
    return min(int(0.75 * cap), 100 * 1024 * 1024)   # ~48 MiB v7x, ~96 MiB v5e/v6e


def _choose_tile_s(hw, c, cout, r, itemsize, vmem_limit, batch):
    """Adaptive spatial tile: big enough to amortize per-step overhead, small
    enough for the VMEM budget, aligned to 128 lanes, minimal last-block waste."""
    hw128 = pl.cdiv(hw, LANE) * LANE
    io_per_lane = itemsize * (2 * c + cout)               # streamed bytes / lane column
    # Target ~4 MiB streamed per grid step (>=1024 lanes) to hide the ~0.35us
    # fixed per-step cost; the HBM roofline plateaus around 512-1024 lane tiles.
    target = max(1024, (4 * 1024 * 1024) // io_per_lane)
    # Double-buffered IO tiles + f32 intermediates (h, wgt, y_rgb, y_dep).
    per_lane_vmem = 2 * io_per_lane + 4 * (4 * c + r)
    vmem_cap = (2 * vmem_limit // 5) // per_lane_vmem     # ~40% of the scoped limit
    max_ts = max(LANE, min(target, vmem_cap, 8192, hw128))
    max_ts = (max_ts // LANE) * LANE

    # Among multiples of 128 <= max_ts, minimize wasted (masked) lanes in the
    # final partial block; tie-break toward the largest tile (fewest steps).
    best_ts, best_key = LANE, None
    ts = max_ts
    while ts >= LANE:
        waste = pl.cdiv(hw, ts) * ts - hw
        key = (waste, -ts)
        if best_key is None or key < best_key:
            best_key, best_ts = key, ts
        ts -= LANE
    tile_s = best_ts

    # v7x megacore balance: ensure the parallel grid has >= 2 blocks when possible
    # (no-op on v5e/v6e which have a single TensorCore).
    if batch * pl.cdiv(hw, tile_s) < 2:
        half = pl.cdiv(pl.cdiv(hw128, 2), LANE) * LANE
        if half >= LANE and pl.cdiv(hw, half) >= 2:
            tile_s = half
    return tile_s


def acw_forward(rgb_feat, depth_feat, params):
    """rgb_feat, depth_feat: (B, C, H, W) float32/bfloat16 (NCHW, like PyTorch).

    params: (w1, b1, w2, b2, w3, b3) in PyTorch Conv2d (k=1) layout:
      w1: (R, 2C)   b1: (R,)
      w2: (2C, R)   b2: (2C,)
      w3: (Cout,2C) b3: (Cout,)
    """
    w1, b1, w2, b2, w3, b3 = params
    B, C, H, W = rgb_feat.shape
    assert depth_feat.shape == (B, C, H, W)
    Ctot = 2 * C
    R = w1.shape[0]
    Cout = w3.shape[0]
    HW = H * W
    io_dtype = rgb_feat.dtype
    itemsize = jnp.dtype(io_dtype).itemsize

    vmem_limit = _vmem_limit_bytes()
    tile_s = _choose_tile_s(HW, C, Cout, R, itemsize, vmem_limit, B)
    grid = (B, pl.cdiv(HW, tile_s))

    # Free reshapes (no transpose, no pad): channels -> sublanes, spatial -> lanes.
    rgb = rgb_feat.reshape(B, C, HW)
    dep = depth_feat.reshape(B, C, HW)

    # Split weights into rgb / depth halves (tiny arrays; fuses the concat).
    w1 = w1.astype(jnp.float32)
    w2 = w2.astype(jnp.float32)
    w3 = w3.astype(jnp.float32)
    w1r, w1d = w1[:, :C], w1[:, C:]
    w3r, w3d = w3[:, :C], w3[:, C:]
    b1c = b1.astype(jnp.float32).reshape(R, 1)
    b2c = b2.astype(jnp.float32).reshape(Ctot, 1)
    b3c = b3.astype(jnp.float32).reshape(Cout, 1)

    # Advisory cost estimate so XLA schedules/overlaps the custom call sensibly.
    macs = B * HW * (2 * Ctot * R + Ctot * Cout)
    weight_bytes = 4 * (w1.size + w2.size + w3.size + b1.size + b2.size + b3.size)
    cost = pl.CostEstimate(
        flops=int(2 * macs + B * HW * (3 * Ctot + R)),
        transcendentals=int(B * HW * Ctot),
        bytes_accessed=int(itemsize * B * HW * (Ctot + Cout) + weight_bytes))

    def build(buffered_weights):
        def wspec(shape):
            # Constant index_map -> single-buffer the resident weights/biases
            # (saves VMEM headroom, mostly relevant on v7x's 64 MiB cores).
            if buffered_weights and hasattr(pl, "Buffered"):
                return pl.BlockSpec(shape, lambda b, s: (0, 0),
                                    pipeline_mode=pl.Buffered(1))
            return pl.BlockSpec(shape, lambda b, s: (0, 0))

        return pl.pallas_call(
            _acw_kernel,
            out_shape=jax.ShapeDtypeStruct((B, Cout, HW), io_dtype),
            grid_spec=pltpu.PrefetchScalarGridSpec(
                num_scalar_prefetch=0,
                grid=grid,
                in_specs=[
                    pl.BlockSpec((None, C, tile_s), lambda b, s: (b, 0, s)),   # rgb
                    pl.BlockSpec((None, C, tile_s), lambda b, s: (b, 0, s)),   # depth
                    wspec((R, C)),        # W1_rgb
                    wspec((R, C)),        # W1_dep
                    wspec((R, 1)),        # b1
                    wspec((Ctot, R)),     # W2
                    wspec((Ctot, 1)),     # b2
                    wspec((Cout, C)),     # W3_rgb
                    wspec((Cout, C)),     # W3_dep
                    wspec((Cout, 1)),     # b3
                ],
                out_specs=pl.BlockSpec((None, Cout, tile_s), lambda b, s: (b, 0, s)),
            ),
            compiler_params=pltpu.CompilerParams(
                dimension_semantics=("parallel", "parallel"),
                vmem_limit_bytes=vmem_limit,
            ),
            cost_estimate=cost,
        )

    args = (rgb, dep, w1r, w1d, b1c, w2, b2c, w3r, w3d, b3c)
    try:
        out = build(True)(*args)
    except Exception:
        # pipeline_mode=pl.Buffered(1) not supported by this JAX version's TPU
        # lowering -> fall back to default double-buffered weight specs.
        out = build(False)(*args)

    return out.reshape(B, Cout, H, W)   # already NCHW -- no transpose needed


def init_params(key, c_rgb, c_depth, reduction=16):
    """Deterministic synthetic weights matching the PyTorch module's shapes
    (Conv2d k=1 weights stored as (out, in) matrices, biases as (out,))."""
    assert c_rgb == c_depth
    ctot = c_rgb + c_depth
    red = ctot // reduction
    assert red >= 1
    k1, k2, k3, k4, k5, k6 = jax.random.split(key, 6)
    w1 = jax.random.normal(k1, (red, ctot), jnp.float32) * 0.1
    b1 = jax.random.normal(k2, (red,), jnp.float32) * 0.1
    w2 = jax.random.normal(k3, (ctot, red), jnp.float32) * 0.1
    b2 = jax.random.normal(k4, (ctot,), jnp.float32) * 0.1
    w3 = jax.random.normal(k5, (c_rgb, ctot), jnp.float32) * 0.1
    b3 = jax.random.normal(k6, (c_rgb,), jnp.float32) * 0.1
    return (w1, b1, w2, b2, w3, b3)


def _reference(rgb_feat, depth_feat, params):
    """Pure-JAX reference matching PyTorch NCHW 1x1-conv semantics."""
    w1, b1, w2, b2, w3, b3 = params
    x = jnp.concatenate([rgb_feat, depth_feat], axis=1).astype(jnp.float32)
    h = jnp.maximum(jnp.einsum('oc,bchw->bohw', w1, x)
                    + b1[None, :, None, None], 0.0)
    wgt = jax.nn.sigmoid(jnp.einsum('oc,bchw->bohw', w2, h)
                         + b2[None, :, None, None])
    y = x * wgt
    out = jnp.einsum('oc,bchw->bohw', w3, y) + b3[None, :, None, None]
    return out


if __name__ == "__main__":
    key = jax.random.PRNGKey(0)
    k1, k2, k3, k4, k5, k6 = jax.random.split(key, 6)

    # Case 1: lane-aligned spatial size. B=2, C=16 (2C=32, reduction 16 -> R=2).
    B, C, H, W = 2, 16, 16, 16
    rgb = jax.random.normal(k1, (B, C, H, W), jnp.float32)
    depth = jax.random.normal(k2, (B, C, H, W), jnp.float32)
    params = init_params(k3, C, C, reduction=16)
    out = jax.block_until_ready(acw_forward(rgb, depth, params))
    ref = _reference(rgb, depth, params)
    assert out.shape == (B, C, H, W)
    assert jnp.allclose(out, ref, atol=1e-4, rtol=1e-4), "mismatch vs reference (aligned)"

    # Case 2: ragged spatial size (HW=130 -> partial last block, masked tail
    # stores) and B=1 (exercises the megacore grid split). C=8, reduction 4.
    B2, C2, H2, W2 = 1, 8, 10, 13
    rgb2 = jax.random.normal(k4, (B2, C2, H2, W2), jnp.float32)
    depth2 = jax.random.normal(k5, (B2, C2, H2, W2), jnp.float32)
    params2 = init_params(k6, C2, C2, reduction=4)
    out2 = jax.block_until_ready(acw_forward(rgb2, depth2, params2))
    ref2 = _reference(rgb2, depth2, params2)
    assert out2.shape == (B2, C2, H2, W2)
    assert jnp.allclose(out2, ref2, atol=1e-4, rtol=1e-4), "mismatch vs reference (ragged)"

    print("KERNEL_OK")
</pallas_src>

<mosaic_0001>
module attributes {stable_mosaic.version = 11 : i64} {
  func.func @_acw_kernel(%arg0: i32, %arg1: i32, %arg2: memref<1x16x256xf32, #tpu.memory_space<vmem>>, %arg3: memref<1x16x256xf32, #tpu.memory_space<vmem>>, %arg4: memref<2x16xf32, #tpu.memory_space<vmem>>, %arg5: memref<2x16xf32, #tpu.memory_space<vmem>>, %arg6: memref<2x1xf32, #tpu.memory_space<vmem>>, %arg7: memref<32x2xf32, #tpu.memory_space<vmem>>, %arg8: memref<32x1xf32, #tpu.memory_space<vmem>>, %arg9: memref<16x16xf32, #tpu.memory_space<vmem>>, %arg10: memref<16x16xf32, #tpu.memory_space<vmem>>, %arg11: memref<16x1xf32, #tpu.memory_space<vmem>>, %arg12: memref<1x16x256xf32, #tpu.memory_space<vmem>>) attributes {dimension_semantics = [#tpu.dimension_semantics<parallel>, #tpu.dimension_semantics<parallel>], iteration_bounds = array<i64: 2, 1>, scalar_prefetch = 0 : i64, scratch_operands = 0 : i64, tpu.core_type = #tpu.core_type<tc>, window_params = [{transform_indices = @transform_0, window_bounds = array<i64: 1, 16, 256>}, {transform_indices = @transform_1, window_bounds = array<i64: 1, 16, 256>}, {pipeline_mode = #tpu.pipeline_mode<synchronous>, transform_indices = @transform_2, window_bounds = array<i64: 2, 16>}, {pipeline_mode = #tpu.pipeline_mode<synchronous>, transform_indices = @transform_3, window_bounds = array<i64: 2, 16>}, {pipeline_mode = #tpu.pipeline_mode<synchronous>, transform_indices = @transform_4, window_bounds = array<i64: 2, 1>}, {pipeline_mode = #tpu.pipeline_mode<synchronous>, transform_indices = @transform_5, window_bounds = array<i64: 32, 2>}, {pipeline_mode = #tpu.pipeline_mode<synchronous>, transform_indices = @transform_6, window_bounds = array<i64: 32, 1>}, {pipeline_mode = #tpu.pipeline_mode<synchronous>, transform_indices = @transform_7, window_bounds = array<i64: 16, 16>}, {pipeline_mode = #tpu.pipeline_mode<synchronous>, transform_indices = @transform_8, window_bounds = array<i64: 16, 16>}, {pipeline_mode = #tpu.pipeline_mode<synchronous>, transform_indices = @transform_9, window_bounds = array<i64: 16, 1>}, {transform_indices = @transform_10, window_bounds = array<i64: 1, 16, 256>}]} {
    %c0 = arith.constant 0 : index
    %c0_0 = arith.constant 0 : index
    %0 = vector.load %arg4[%c0, %c0_0] : memref<2x16xf32, #tpu.memory_space<vmem>>, vector<2x16xf32>
    %c0_1 = arith.constant 0 : index
    %c0_2 = arith.constant 0 : index
    %c0_3 = arith.constant 0 : index
    %1 = vector.load %arg2[%c0_1, %c0_2, %c0_3] : memref<1x16x256xf32, #tpu.memory_space<vmem>>, vector<1x16x256xf32>
    %2 = vector.shape_cast %1 : vector<1x16x256xf32> to vector<16x256xf32>
    %cst = arith.constant dense<0.000000e+00> : vector<2x256xf32>
    %3 = tpu.matmul %0, %2, %cst {dimension_numbers = #tpu.dot_dimension_numbers<[1], [0], [0], [1], [0, 0, 1, 1], [], []>} : vector<2x16xf32>, vector<16x256xf32>, vector<2x256xf32> -> vector<2x256xf32>
    %c0_4 = arith.constant 0 : index
    %c0_5 = arith.constant 0 : index
    %4 = vector.load %arg5[%c0_4, %c0_5] : memref<2x16xf32, #tpu.memory_space<vmem>>, vector<2x16xf32>
    %c0_6 = arith.constant 0 : index
    %c0_7 = arith.constant 0 : index
    %c0_8 = arith.constant 0 : index
    %5 = vector.load %arg3[%c0_6, %c0_7, %c0_8] : memref<1x16x256xf32, #tpu.memory_space<vmem>>, vector<1x16x256xf32>
    %6 = vector.shape_cast %5 : vector<1x16x256xf32> to vector<16x256xf32>
    %cst_9 = arith.constant dense<0.000000e+00> : vector<2x256xf32>
    %7 = tpu.matmul %4, %6, %cst_9 {dimension_numbers = #tpu.dot_dimension_numbers<[1], [0], [0], [1], [0, 0, 1, 1], [], []>} : vector<2x16xf32>, vector<16x256xf32>, vector<2x256xf32> -> vector<2x256xf32>
    %8 = arith.addf %3, %7 : vector<2x256xf32>
    %c0_10 = arith.constant 0 : index
    %c0_11 = arith.constant 0 : index
    %9 = vector.load %arg6[%c0_10, %c0_11] : memref<2x1xf32, #tpu.memory_space<vmem>>, vector<2x1xf32>
    %10 = vector.broadcast %9 : vector<2x1xf32> to vector<2x256xf32>
    %11 = arith.addf %8, %10 : vector<2x256xf32>
    %cst_12 = arith.constant 0.000000e+00 : f32
    %12 = vector.broadcast %cst_12 : f32 to vector<2x256xf32>
    %13 = arith.maximumf %11, %12 : vector<2x256xf32>
    %c0_13 = arith.constant 0 : index
    %c0_14 = arith.constant 0 : index
    %14 = vector.load %arg7[%c0_13, %c0_14] : memref<32x2xf32, #tpu.memory_space<vmem>>, vector<32x2xf32>
    %cst_15 = arith.constant dense<0.000000e+00> : vector<32x256xf32>
    %15 = tpu.matmul %14, %13, %cst_15 {dimension_numbers = #tpu.dot_dimension_numbers<[1], [0], [0], [1], [0, 0, 1, 1], [], []>} : vector<32x2xf32>, vector<2x256xf32>, vector<32x256xf32> -> vector<32x256xf32>
    %c0_16 = arith.constant 0 : index
    %c0_17 = arith.constant 0 : index
    %16 = vector.load %arg8[%c0_16, %c0_17] : memref<32x1xf32, #tpu.memory_space<vmem>>, vector<32x1xf32>
    %17 = vector.broadcast %16 : vector<32x1xf32> to vector<32x256xf32>
    %18 = arith.addf %15, %17 : vector<32x256xf32>
    %19 = arith.negf %18 : vector<32x256xf32>
    %20 = math.exp %19 : vector<32x256xf32>
    %cst_18 = arith.constant 1.000000e+00 : f32
    %21 = vector.broadcast %cst_18 : f32 to vector<32x256xf32>
    %22 = arith.addf %21, %20 : vector<32x256xf32>
    %23 = arith.divf %21, %22 : vector<32x256xf32>
    %c0_19 = arith.constant 0 : index
    %c0_20 = arith.constant 0 : index
    %c0_21 = arith.constant 0 : index
    %24 = vector.load %arg2[%c0_19, %c0_20, %c0_21] : memref<1x16x256xf32, #tpu.memory_space<vmem>>, vector<1x16x256xf32>
    %25 = vector.shape_cast %24 : vector<1x16x256xf32> to vector<16x256xf32>
    %26 = vector.extract_strided_slice %23 {offsets = [0, 0], sizes = [16, 256], strides = [1, 1]} : vector<32x256xf32> to vector<16x256xf32>
    %27 = arith.mulf %25, %26 : vector<16x256xf32>
    %c0_22 = arith.constant 0 : index
    %c0_23 = arith.constant 0 : index
    %c0_24 = arith.constant 0 : index
    %28 = vector.load %arg3[%c0_22, %c0_23, %c0_24] : memref<1x16x256xf32, #tpu.memory_space<vmem>>, vector<1x16x256xf32>
    %29 = vector.shape_cast %28 : vector<1x16x256xf32> to vector<16x256xf32>
    %30 = vector.extract_strided_slice %23 {offsets = [16, 0], sizes = [16, 256], strides = [1, 1]} : vector<32x256xf32> to vector<16x256xf32>
    %31 = arith.mulf %29, %30 : vector<16x256xf32>
    %c0_25 = arith.constant 0 : index
    %c0_26 = arith.constant 0 : index
    %32 = vector.load %arg9[%c0_25, %c0_26] : memref<16x16xf32, #tpu.memory_space<vmem>>, vector<16x16xf32>
    %cst_27 = arith.constant dense<0.000000e+00> : vector<16x256xf32>
    %33 = tpu.matmul %32, %27, %cst_27 {dimension_numbers = #tpu.dot_dimension_numbers<[1], [0], [0], [1], [0, 0, 1, 1], [], []>} : vector<16x16xf32>, vector<16x256xf32>, vector<16x256xf32> -> vector<16x256xf32>
    %c0_28 = arith.constant 0 : index
    %c0_29 = arith.constant 0 : index
    %34 = vector.load %arg10[%c0_28, %c0_29] : memref<16x16xf32, #tpu.memory_space<vmem>>, vector<16x16xf32>
    %cst_30 = arith.constant dense<0.000000e+00> : vector<16x256xf32>
    %35 = tpu.matmul %34, %31, %cst_30 {dimension_numbers = #tpu.dot_dimension_numbers<[1], [0], [0], [1], [0, 0, 1, 1], [], []>} : vector<16x16xf32>, vector<16x256xf32>, vector<16x256xf32> -> vector<16x256xf32>
    %36 = arith.addf %33, %35 : vector<16x256xf32>
    %c0_31 = arith.constant 0 : index
    %c0_32 = arith.constant 0 : index
    %37 = vector.load %arg11[%c0_31, %c0_32] : memref<16x1xf32, #tpu.memory_space<vmem>>, vector<16x1xf32>
    %38 = vector.broadcast %37 : vector<16x1xf32> to vector<16x256xf32>
    %39 = arith.addf %36, %38 : vector<16x256xf32>
    %c0_33 = arith.constant 0 : index
    %c0_34 = arith.constant 0 : index
    %c0_35 = arith.constant 0 : index
    %40 = vector.load %arg12[%c0_33, %c0_34, %c0_35] : memref<1x16x256xf32, #tpu.memory_space<vmem>>, vector<1x16x256xf32>
    %41 = vector.shape_cast %40 : vector<1x16x256xf32> to vector<16x256xf32>
    %42 = vector.shape_cast %39 : vector<16x256xf32> to vector<1x16x256xf32>
    tpu.vector_store %arg12[%c0_33, %c0_34, %c0_35], %42 {strides = array<i32>} : memref<1x16x256xf32, #tpu.memory_space<vmem>>, vector<1x16x256xf32>,
    return
  }
  func.func @transform_0(%arg0: i32, %arg1: i32) -> (i32, i32, i32) {
    %c0_i32 = arith.constant 0 : i32
    %c0_i32_0 = arith.constant 0 : i32
    return %arg0, %c0_i32, %arg1 : i32, i32, i32
  }
  func.func @transform_1(%arg0: i32, %arg1: i32) -> (i32, i32, i32) {
    %c0_i32 = arith.constant 0 : i32
    %c0_i32_0 = arith.constant 0 : i32
    return %arg0, %c0_i32, %arg1 : i32, i32, i32
  }
  func.func @transform_2(%arg0: i32, %arg1: i32) -> (i32, i32) {
    %c0_i32 = arith.constant 0 : i32
    %c0_i32_0 = arith.constant 0 : i32
    %c0_i32_1 = arith.constant 0 : i32
    return %c0_i32, %c0_i32_0 : i32, i32
  }
  func.func @transform_3(%arg0: i32, %arg1: i32) -> (i32, i32) {
    %c0_i32 = arith.constant 0 : i32
    %c0_i32_0 = arith.constant 0 : i32
    %c0_i32_1 = arith.constant 0 : i32
    return %c0_i32, %c0_i32_0 : i32, i32
  }
  func.func @transform_4(%arg0: i32, %arg1: i32) -> (i32, i32) {
    %c0_i32 = arith.constant 0 : i32
    %c0_i32_0 = arith.constant 0 : i32
    %c0_i32_1 = arith.constant 0 : i32
    return %c0_i32, %c0_i32_0 : i32, i32
  }
  func.func @transform_5(%arg0: i32, %arg1: i32) -> (i32, i32) {
    %c0_i32 = arith.constant 0 : i32
    %c0_i32_0 = arith.constant 0 : i32
    %c0_i32_1 = arith.constant 0 : i32
    return %c0_i32, %c0_i32_0 : i32, i32
  }
  func.func @transform_6(%arg0: i32, %arg1: i32) -> (i32, i32) {
    %c0_i32 = arith.constant 0 : i32
    %c0_i32_0 = arith.constant 0 : i32
    %c0_i32_1 = arith.constant 0 : i32
    return %c0_i32, %c0_i32_0 : i32, i32
  }
  func.func @transform_7(%arg0: i32, %arg1: i32) -> (i32, i32) {
    %c0_i32 = arith.constant 0 : i32
    %c0_i32_0 = arith.constant 0 : i32
    %c0_i32_1 = arith.constant 0 : i32
    return %c0_i32, %c0_i32_0 : i32, i32
  }
  func.func @transform_8(%arg0: i32, %arg1: i32) -> (i32, i32) {
    %c0_i32 = arith.constant 0 : i32
    %c0_i32_0 = arith.constant 0 : i32
    %c0_i32_1 = arith.constant 0 : i32
    return %c0_i32, %c0_i32_0 : i32, i32
  }
  func.func @transform_9(%arg0: i32, %arg1: i32) -> (i32, i32) {
    %c0_i32 = arith.constant 0 : i32
    %c0_i32_0 = arith.constant 0 : i32
    %c0_i32_1 = arith.constant 0 : i32
    return %c0_i32, %c0_i32_0 : i32, i32
  }
  func.func @transform_10(%arg0: i32, %arg1: i32) -> (i32, i32, i32) {
    %c0_i32 = arith.constant 0 : i32
    %c0_i32_0 = arith.constant 0 : i32
    return %arg0, %c0_i32, %arg1 : i32, i32, i32
  }
}

module attributes {stable_mosaic.version = 11 : i64} {
  func.func @_acw_kernel(%arg0: i32, %arg1: i32, %arg2: memref<1x16x256xf32, #tpu.memory_space<vmem>>, %arg3: memref<1x16x256xf32, #tpu.memory_space<vmem>>, %arg4: memref<2x16xf32, #tpu.memory_space<vmem>>, %arg5: memref<2x16xf32, #tpu.memory_space<vmem>>, %arg6: memref<2x1xf32, #tpu.memory_space<vmem>>, %arg7: memref<32x2xf32, #tpu.memory_space<vmem>>, %arg8: memref<32x1xf32, #tpu.memory_space<vmem>>, %arg9: memref<16x16xf32, #tpu.memory_space<vmem>>, %arg10: memref<16x16xf32, #tpu.memory_space<vmem>>, %arg11: memref<16x1xf32, #tpu.memory_space<vmem>>, %arg12: memref<1x16x256xf32, #tpu.memory_space<vmem>>) attributes {dimension_semantics = [#tpu.dimension_semantics<parallel>, #tpu.dimension_semantics<parallel>], iteration_bounds = array<i64: 2, 1>, scalar_prefetch = 0 : i64, scratch_operands = 0 : i64, tpu.core_type = #tpu.core_type<tc>, window_params = [{transform_indices = @transform_0, window_bounds = array<i64: 1, 16, 256>}, {transform_indices = @transform_1, window_bounds = array<i64: 1, 16, 256>}, {pipeline_mode = #tpu.pipeline_mode<synchronous>, transform_indices = @transform_2, window_bounds = array<i64: 2, 16>}, {pipeline_mode = #tpu.pipeline_mode<synchronous>, transform_indices = @transform_3, window_bounds = array<i64: 2, 16>}, {pipeline_mode = #tpu.pipeline_mode<synchronous>, transform_indices = @transform_4, window_bounds = array<i64: 2, 1>}, {pipeline_mode = #tpu.pipeline_mode<synchronous>, transform_indices = @transform_5, window_bounds = array<i64: 32, 2>}, {pipeline_mode = #tpu.pipeline_mode<synchronous>, transform_indices = @transform_6, window_bounds = array<i64: 32, 1>}, {pipeline_mode = #tpu.pipeline_mode<synchronous>, transform_indices = @transform_7, window_bounds = array<i64: 16, 16>}, {pipeline_mode = #tpu.pipeline_mode<synchronous>, transform_indices = @transform_8, window_bounds = array<i64: 16, 16>}, {pipeline_mode = #tpu.pipeline_mode<synchronous>, transform_indices = @transform_9, window_bounds = array<i64: 16, 1>}, {transform_indices = @transform_10, window_bounds = array<i64: 1, 16, 256>}]} {
    %c0 = arith.constant 0 : index
    %c0_0 = arith.constant 0 : index
    %0 = vector.load %arg4[%c0, %c0_0] : memref<2x16xf32, #tpu.memory_space<vmem>>, vector<2x16xf32>
    %c0_1 = arith.constant 0 : index
    %c0_2 = arith.constant 0 : index
    %c0_3 = arith.constant 0 : index
    %1 = vector.load %arg2[%c0_1, %c0_2, %c0_3] : memref<1x16x256xf32, #tpu.memory_space<vmem>>, vector<1x16x256xf32>
    %2 = vector.shape_cast %1 : vector<1x16x256xf32> to vector<16x256xf32>
    %cst = arith.constant dense<0.000000e+00> : vector<2x256xf32>
    %3 = tpu.matmul %0, %2, %cst {dimension_numbers = #tpu.dot_dimension_numbers<[1], [0], [0], [1], [0, 0, 1, 1], [], []>} : vector<2x16xf32>, vector<16x256xf32>, vector<2x256xf32> -> vector<2x256xf32>
    %c0_4 = arith.constant 0 : index
    %c0_5 = arith.constant 0 : index
    %4 = vector.load %arg5[%c0_4, %c0_5] : memref<2x16xf32, #tpu.memory_space<vmem>>, vector<2x16xf32>
    %c0_6 = arith.constant 0 : index
    %c0_7 = arith.constant 0 : index
    %c0_8 = arith.constant 0 : index
    %5 = vector.load %arg3[%c0_6, %c0_7, %c0_8] : memref<1x16x256xf32, #tpu.memory_space<vmem>>, vector<1x16x256xf32>
    %6 = vector.shape_cast %5 : vector<1x16x256xf32> to vector<16x256xf32>
    %cst_9 = arith.constant dense<0.000000e+00> : vector<2x256xf32>
    %7 = tpu.matmul %4, %6, %cst_9 {dimension_numbers = #tpu.dot_dimension_numbers<[1], [0], [0], [1], [0, 0, 1, 1], [], []>} : vector<2x16xf32>, vector<16x256xf32>, vector<2x256xf32> -> vector<2x256xf32>
    %8 = arith.addf %3, %7 : vector<2x256xf32>
    %c0_10 = arith.constant 0 : index
    %c0_11 = arith.constant 0 : index
    %9 = vector.load %arg6[%c0_10, %c0_11] : memref<2x1xf32, #tpu.memory_space<vmem>>, vector<2x1xf32>
    %10 = vector.broadcast %9 : vector<2x1xf32> to vector<2x256xf32>
    %11 = arith.addf %8, %10 : vector<2x256xf32>
    %cst_12 = arith.constant 0.000000e+00 : f32
    %12 = vector.broadcast %cst_12 : f32 to vector<2x256xf32>
    %13 = arith.maximumf %11, %12 : vector<2x256xf32>
    %c0_13 = arith.constant 0 : index
    %c0_14 = arith.constant 0 : index
    %14 = vector.load %arg7[%c0_13, %c0_14] : memref<32x2xf32, #tpu.memory_space<vmem>>, vector<32x2xf32>
    %cst_15 = arith.constant dense<0.000000e+00> : vector<32x256xf32>
    %15 = tpu.matmul %14, %13, %cst_15 {dimension_numbers = #tpu.dot_dimension_numbers<[1], [0], [0], [1], [0, 0, 1, 1], [], []>} : vector<32x2xf32>, vector<2x256xf32>, vector<32x256xf32> -> vector<32x256xf32>
    %c0_16 = arith.constant 0 : index
    %c0_17 = arith.constant 0 : index
    %16 = vector.load %arg8[%c0_16, %c0_17] : memref<32x1xf32, #tpu.memory_space<vmem>>, vector<32x1xf32>
    %17 = vector.broadcast %16 : vector<32x1xf32> to vector<32x256xf32>
    %18 = arith.addf %15, %17 : vector<32x256xf32>
    %19 = arith.negf %18 : vector<32x256xf32>
    %20 = math.exp %19 : vector<32x256xf32>
    %cst_18 = arith.constant 1.000000e+00 : f32
    %21 = vector.broadcast %cst_18 : f32 to vector<32x256xf32>
    %22 = arith.addf %21, %20 : vector<32x256xf32>
    %23 = arith.divf %21, %22 : vector<32x256xf32>
    %c0_19 = arith.constant 0 : index
    %c0_20 = arith.constant 0 : index
    %c0_21 = arith.constant 0 : index
    %24 = vector.load %arg2[%c0_19, %c0_20, %c0_21] : memref<1x16x256xf32, #tpu.memory_space<vmem>>, vector<1x16x256xf32>
    %25 = vector.shape_cast %24 : vector<1x16x256xf32> to vector<16x256xf32>
    %26 = vector.extract_strided_slice %23 {offsets = [0, 0], sizes = [16, 256], strides = [1, 1]} : vector<32x256xf32> to vector<16x256xf32>
    %27 = arith.mulf %25, %26 : vector<16x256xf32>
    %c0_22 = arith.constant 0 : index
    %c0_23 = arith.constant 0 : index
    %c0_24 = arith.constant 0 : index
    %28 = vector.load %arg3[%c0_22, %c0_23, %c0_24] : memref<1x16x256xf32, #tpu.memory_space<vmem>>, vector<1x16x256xf32>
    %29 = vector.shape_cast %28 : vector<1x16x256xf32> to vector<16x256xf32>
    %30 = vector.extract_strided_slice %23 {offsets = [16, 0], sizes = [16, 256], strides = [1, 1]} : vector<32x256xf32> to vector<16x256xf32>
    %31 = arith.mulf %29, %30 : vector<16x256xf32>
    %c0_25 = arith.constant 0 : index
    %c0_26 = arith.constant 0 : index
    %32 = vector.load %arg9[%c0_25, %c0_26] : memref<16x16xf32, #tpu.memory_space<vmem>>, vector<16x16xf32>
    %cst_27 = arith.constant dense<0.000000e+00> : vector<16x256xf32>
    %33 = tpu.matmul %32, %27, %cst_27 {dimension_numbers = #tpu.dot_dimension_numbers<[1], [0], [0], [1], [0, 0, 1, 1], [], []>} : vector<16x16xf32>, vector<16x256xf32>, vector<16x256xf32> -> vector<16x256xf32>
    %c0_28 = arith.constant 0 : index
    %c0_29 = arith.constant 0 : index
    %34 = vector.load %arg10[%c0_28, %c0_29] : memref<16x16xf32, #tpu.memory_space<vmem>>, vector<16x16xf32>
    %cst_30 = arith.constant dense<0.000000e+00> : vector<16x256xf32>
    %35 = tpu.matmul %34, %31, %cst_30 {dimension_numbers = #tpu.dot_dimension_numbers<[1], [0], [0], [1], [0, 0, 1, 1], [], []>} : vector<16x16xf32>, vector<16x256xf32>, vector<16x256xf32> -> vector<16x256xf32>
    %36 = arith.addf %33, %35 : vector<16x256xf32>
    %c0_31 = arith.constant 0 : index
    %c0_32 = arith.constant 0 : index
    %37 = vector.load %arg11[%c0_31, %c0_32] : memref<16x1xf32, #tpu.memory_space<vmem>>, vector<16x1xf32>
    %38 = vector.broadcast %37 : vector<16x1xf32> to vector<16x256xf32>
    %39 = arith.addf %36, %38 : vector<16x256xf32>
    %c0_33 = arith.constant 0 : index
    %c0_34 = arith.constant 0 : index
    %c0_35 = arith.constant 0 : index
    %40 = vector.load %arg12[%c0_33, %c0_34, %c0_35] : memref<1x16x256xf32, #tpu.memory_space<vmem>>, vector<1x16x256xf32>
    %41 = vector.shape_cast %40 : vector<1x16x256xf32> to vector<16x256xf32>
    %42 = vector.shape_cast %39 : vector<16x256xf32> to vector<1x16x256xf32>
    tpu.vector_store %arg12[%c0_33, %c0_34, %c0_35], %42 {strides = array<i32>} : memref<1x16x256xf32, #tpu.memory_space<vmem>>, vector<1x16x256xf32>,
    return
  }
  func.func @transform_0(%arg0: i32, %arg1: i32) -> (i32, i32, i32) {
    %c0_i32 = arith.constant 0 : i32
    %c0_i32_0 = arith.constant 0 : i32
    return %arg0, %c0_i32, %arg1 : i32, i32, i32
  }
  func.func @transform_1(%arg0: i32, %arg1: i32) -> (i32, i32, i32) {
    %c0_i32 = arith.constant 0 : i32
    %c0_i32_0 = arith.constant 0 : i32
    return %arg0, %c0_i32, %arg1 : i32, i32, i32
  }
  func.func @transform_2(%arg0: i32, %arg1: i32) -> (i32, i32) {
    %c0_i32 = arith.constant 0 : i32
    %c0_i32_0 = arith.constant 0 : i32
    %c0_i32_1 = arith.constant 0 : i32
    return %c0_i32, %c0_i32_0 : i32, i32
  }
  func.func @transform_3(%arg0: i32, %arg1: i32) -> (i32, i32) {
    %c0_i32 = arith.constant 0 : i32
    %c0_i32_0 = arith.constant 0 : i32
    %c0_i32_1 = arith.constant 0 : i32
    return %c0_i32, %c0_i32_0 : i32, i32
  }
  func.func @transform_4(%arg0: i32, %arg1: i32) -> (i32, i32) {
    %c0_i32 = arith.constant 0 : i32
    %c0_i32_0 = arith.constant 0 : i32
    %c0_i32_1 = arith.constant 0 : i32
    return %c0_i32, %c0_i32_0 : i32, i32
  }
  func.func @transform_5(%arg0: i32, %arg1: i32) -> (i32, i32) {
    %c0_i32 = arith.constant 0 : i32
    %c0_i32_0 = arith.constant 0 : i32
    %c0_i32_1 = arith.constant 0 : i32
    return %c0_i32, %c0_i32_0 : i32, i32
  }
  func.func @transform_6(%arg0: i32, %arg1: i32) -> (i32, i32) {
    %c0_i32 = arith.constant 0 : i32
    %c0_i32_0 = arith.constant 0 : i32
    %c0_i32_1 = arith.constant 0 : i32
    return %c0_i32, %c0_i32_0 : i32, i32
  }
  func.func @transform_7(%arg0: i32, %arg1: i32) -> (i32, i32) {
    %c0_i32 = arith.constant 0 : i32
    %c0_i32_0 = arith.constant 0 : i32
    %c0_i32_1 = arith.constant 0 : i32
    return %c0_i32, %c0_i32_0 : i32, i32
  }
  func.func @transform_8(%arg0: i32, %arg1: i32) -> (i32, i32) {
    %c0_i32 = arith.constant 0 : i32
    %c0_i32_0 = arith.constant 0 : i32
    %c0_i32_1 = arith.constant 0 : i32
    return %c0_i32, %c0_i32_0 : i32, i32
  }
  func.func @transform_9(%arg0: i32, %arg1: i32) -> (i32, i32) {
    %c0_i32 = arith.constant 0 : i32
    %c0_i32_0 = arith.constant 0 : i32
    %c0_i32_1 = arith.constant 0 : i32
    return %c0_i32, %c0_i32_0 : i32, i32
  }
  func.func @transform_10(%arg0: i32, %arg1: i32) -> (i32, i32, i32) {
    %c0_i32 = arith.constant 0 : i32
    %c0_i32_0 = arith.constant 0 : i32
    return %arg0, %c0_i32, %arg1 : i32, i32, i32
  }
}

</mosaic_0001>

<bundles_post_ra>
// kernel: tpu_custom_call.1
= control target key start
LH: loop header
LB: loop body
LE: loop exit
PB: predicated region body
PF: predicated region fallthrough
CT: control target
= control target key end

     0   :  { %s1839_s0 = inlined_call_operand.vmem [shape: f32[2,16,256], index: 0, kind: input, shape index: {}]   ;;  %s1840_s1 = inlined_call_operand.hbm [shape: f32[2,16,256], index: 1, kind: input, shape index: {}]   ;;  %s1841_s2 = inlined_call_operand.hbm [shape: f32[2,16], index: 2, kind: input, shape index: {}]   ;;  %s1842_s3 = inlined_call_operand.hbm [shape: f32[2,16], index: 3, kind: input, shape index: {}]   ;;  %s1843_s4 = inlined_call_operand.vmem [shape: f32[2,1], index: 4, kind: input, shape index: {}]   ;;  %s1844_s5 = inlined_call_operand.vmem [shape: f32[32,2], index: 5, kind: input, shape index: {}]   ;;  %s1845_s6 = inlined_call_operand.vmem [shape: f32[32,1], index: 6, kind: input, shape index: {}]   ;;  %s1846_s7 = inlined_call_operand.vmem [shape: f32[16,16], index: 7, kind: input, shape index: {}]   ;;  %s1847_s8 = inlined_call_operand.vmem [shape: f32[16,16], index: 8, kind: input, shape index: {}]   ;;  %s1848_s9 = inlined_call_operand.vmem [shape: f32[16,1], index: 9, kind: input, shape index: {}]   ;;  %s1849_s10 = inlined_call_operand.hbm [shape: f32[2,16,256], index: 10, kind: output, shape index: {}]  }
   0x1   :  { %1864 = sst [smem:[#allocation16_spill]] %s1841_s2 }
   0x2   :  { %1865 = sst [smem:[#allocation17_spill]] %s1842_s3 }
   0x3   :  { %1866 = sst [smem:[#allocation18_spill]] %s1846_s7 }
   0x4   :  { %1867 = sst [smem:[#allocation19_spill]] %s1849_s10 }
   0x5   :  { %15 = vsyncpa [#allocation3], 0 }
   0x6   :  { %17 = vsyncpa [#allocation3 + $0x1], 0 }
   0x7   :  { %18 = vsyncpa [#allocation6], 0 }
   0x8   :  { %19 = vsyncpa [#allocation4], 0 }
   0x9   :  { %21 = vsyncpa [#allocation4 + $0x1], 0  ;;  %s1549_s13 = smov 0   ;;  %s1551_s14 = smov 0  }
   0xa   :  { %s1553_s15 = smov 0   ;;  %s1555_s16 = smov 0  }
   0xb   :  { %s1557_s17 = smov 0   ;;  %s1559_s18 = smov 0  }
   0xc LB: > { %1868 = sst [smem:[#allocation12_spill]] %s1462_s13  ;;  %s1151_s19 = sadd.s32 4294967295, %s1482_s18   ;;  %s1482_s18 = sphi %s1559_s18, %s27_s18   ;;  %s1478_s17 = sphi %s1557_s17, %s1900_s17   ;;  %s1474_s16 = sphi %s1555_s16, %s1899_s16   ;;  %s1470_s15 = sphi %s1553_s15, %s1898_s15   ;;  %s1466_s14 = sphi %s1551_s14, %s1897_s14   ;;  %s1462_s13 = sphi %s1549_s13, %s1896_s13  }
   0xd   : > { %1869 = sst [smem:[#allocation13_spill]] %s1482_s18  ;;  %s1152_s20 = sadd.s32 4294967294, %s1482_s18  }
   0xe   : > { %p83_p0 = scmp.ne.s32.totalorder %s1470_s15, %s1466_s14  ;;  %p84_p1 = scmp.eq.s32.totalorder %s1482_s18, 0 }
   0xf   : > { %p89_p2 = scmp.ne.s32.totalorder %s1466_s14, %s1462_s13  ;;  %p1587_p3 = scmp.eq.s32.totalorder %s1151_s19, 0 }
  0x10   : > { %p283_p4 = scmp.eq.s32.totalorder %s1151_s19, 1  ;;  %p1591_p5 = por %p84_p1, %p83_p0 }
  0x11   : > { %s1870_s22 = scalar_select %p1587_p3, 1, 0 }
  0x12   : > { %p289_p6 = scmp.eq.s32.totalorder %s1152_s20, 1  ;;  %p1597_p7 = por %p1587_p3, %p89_p2 }
  0x13   : > { %p1601_p8 = por %p283_p4, %p83_p0  ;;  %p1153_p10 = scmp.ge.s32.totalorder %s1482_s18, 1 }
  0x14   : > { %s1872_s24 = scalar_select %p1597_p7, 1, 0 }
  0x15   : > { %s1873_s25 = scalar_select %p1601_p8, 1, 0 }
  0x16   : > { %p1605_p9 = por %p289_p6, %p89_p2  ;;  %p296_p11 = scmp.lt.s32.totalorder %s1482_s18, 3 }
  0x17   : > { %1874 = sst [smem:[#allocation14_spill]] %s1873_s25  ;;  %s1484_s28 = smov [#allocation5]  }
  0x18   : > { %s1875_s26 = scalar_select %p1605_p9, 1, 0 }
  0x19   : > { %p1612_p13 = pnand %p1153_p10, %p296_p11  ;;  %s309_s29 = sshll.u32 %s1484_s28, 4  ;;  %s310_s29 = int_to_ptr.vmem [resolvable:$true] %s309_s29 }
  0x1a   : > { %1876 = sst [smem:[#allocation15_spill]] %s1875_s26  ;;  %p1224_p1 = scmp.lt.s32.totalorder %s1482_s18, 2 }
  0x1b   : > { %s1877_s27 = scalar_select %p1612_p13, 1, 0 }
  0x1c   : > { %p1207_p0 = pneg %p1612_p13  ;;  %p1621_p4 = pnand %p1224_p1, %p1591_p5 }
  0x1d   : > { %s1485_s11 = smov [#allocation7]   ;;  %s1329_s20 = scalar_lea.vmem %s310_s29, 32 }
  0x1e   : > { %s1878_s30 = scalar_select %p1621_p4, 1, 0 }
  0x1f   : > { %s320_s12 = sshll.u32 %s1485_s11, 4  ;;  %p1627_p2 = pnand %p1207_p0, %p1587_p3  ;;  %s321_s12 = int_to_ptr.vmem [resolvable:$true] %s320_s12 }
  0x20   : > { %p1330_p10 = scmp.ne.s32.totalorder %s310_s29, %s1329_s20  ;;  %p1337_p1 = scmp.lt.s32.totalorder %s310_s29, %s310_s29 }
  0x21   : > { %p1320_p6 = pneg %p1627_p2  ;;  %p1338_p12 = scmp.lt.s32.totalorder %s1329_s20, %s1329_s20 }
  0x23   : > { %p1332_p5 = pnand %p1330_p10, %p1320_p6  ;;  %p1339_p9 = por %p1338_p12, %p1337_p1 }
  0x25   : > { %p1333_p11 = pneg %p1332_p5 }
  0x27   : > { %p1340_p8 = pnand %p1339_p9, %p1333_p11 }
  0x29   : > { %1343 = shalt.err (!%p1340_p8)
}
  0x2a   : > { %s1880_s2 = sld [smem:[#allocation16_spill]]  ;;  %s1355_s11 = scalar_lea.vmem %s321_s12, 32 }
  0x2b   : > { %p1356_p0 = scmp.ne.s32.totalorder %s321_s12, %s1355_s11  ;;  %p1363_p10 = scmp.lt.s32.totalorder %s321_s12, %s321_s12 }
  0x2c   : > { %p1364_p5 = scmp.lt.s32.totalorder %s1355_s11, %s1355_s11 }
  0x2d   : > { %p1358_p3 = pnand %p1356_p0, %p1320_p6 }
  0x2e   : > { %p1365_p13 = por %p1364_p5, %p1363_p10 }
  0x2f   : > { %p1359_p7 = pneg %p1358_p3 }
  0x30   : > { %1210 = dma.hbm_to_vmem [thread:$0]  (!%p1627_p2), %s1880_s2, 32, %s310_s29, [#allocation6]  }
  0x31   : > { %p1366_p4 = pnand %p1365_p13, %p1359_p7 }
  0x33   : > { %1369 = shalt.err (!%p1366_p4)
}
  0x34   : > { %s1881_s3 = sld [smem:[#allocation17_spill]]  ;;  %s39_s29 = sadd.s32 1, %s1478_s17 }
  0x35   : > { %s362_s23 = sand.u32 1, %s1470_s15   ;;  %p41_p3 = scmp.ge.s32.totalorder %s39_s29, 2 }
  0x36   : > { %s1157_s28 = sshll.u32 %s362_s23, 5  ;;  %s1192_s11 = sshll.u32 %s1478_s17, 9 }
  0x37   : > { %s1902_s29 = smov (%p41_p3, %s39_s29), 0  ;;  %s374_s21 = scalar_lea.hbm %s1840_s1, %s1192_s11 }
  0x38   : > { %s71_s20 = ssub.s32 %s1478_s17, %s1902_s29  ;;  %s366_s18 = scalar_lea.vmem [#allocation2], %s1157_s28 }
  0x39   : > { %s375_s26 = sshll.u32 %s366_s18, 4  ;;  %p74_p7 = scmp.eq.s32.totalorder %s71_s20, 0  ;;  %s376_s26 = int_to_ptr.vmem [resolvable:$true] %s375_s26 }
  0x3a   : > { %1213 = dma.hbm_to_vmem [thread:$0]  (!%p1627_p2), %s1881_s3, 32, %s321_s12, [#allocation6]  }
  0x3b   : > { %s1882_s13 = sadd.s32 1, %s1470_s15  ;;  %s363_s12 = scalar_lea.sflag [#allocation3], %s362_s23 }
  0x3c   : > { %s1662_s10 = scalar_select %p74_p7, %s1470_s15, %s1882_s13  }
  0x3d   : > { %p1883_p8 = scmp.ne.s32.totalorder %s1878_s30, 0  ;;  %s1383_s3 = scalar_lea.vmem %s376_s26, 512 }
  0x3e   : > { %p1384_p12 = scmp.ne.s32.totalorder %s376_s26, %s1383_s3  ;;  %s1486_s25 = smov [#allocation2]  }
  0x3f   : > { %p1372_p9 = pneg %p1883_p8  ;;  %s1388_s7 = sshll.u32 %s1486_s25, 4  ;;  %s1389_s7 = int_to_ptr.vmem [resolvable:$false] %s1388_s7 }
  0x40   : > { %s1390_s2 = scalar_lea.vmem %s1389_s7, 1024  ;;  %p1391_p2 = scmp.lt.s32.totalorder %s376_s26, %s1389_s7 }
  0x41   : > { %p1386_p13 = pnand %p1384_p12, %p1372_p9  ;;  %p1392_p6 = scmp.lt.s32.totalorder %s1390_s2, %s1383_s3 }
  0x43   : > { %p1387_p4 = pneg %p1386_p13  ;;  %p1393_p11 = por %p1392_p6, %p1391_p2 }
  0x45   : > { %p1394_p1 = pnand %p1393_p11, %p1387_p4 }
  0x47   : > { %1397 = shalt.err (!%p1394_p1)
}
  0x48   : > { %s1487_s18 = smov 256   ;;  %s1488_s13 = smov 16  }
  0x49   : > { %1217 = dma.hbm_to_vmem [thread:$0]  (!%p1883_p8), %s374_s21, 512, %s376_s26, %s363_s12, %s1487_s18, %s1487_s18, %s1488_s13  }
  0x4a   : > { %p1884_p0 = scmp.ne.s32.totalorder %s1877_s27, 0 }
  0x4b   : > { %s1671_s23 = sand.u32 (!%p1884_p0), 1, %s1466_s14   ;;  %p1885_p10 = scmp.ne.s32.totalorder (!%p1884_p0), %s1872_s24, 0 }
  0x4c   : > { %387 = sbr.rel (%p1884_p0) target bundleno = 771 (0x303), region = 60  ;;  %s1161_s7 = sshll.u32 (!%p1884_p0), %s1671_s23, 5 }
  0x4d   : > { %s390_s3 = scalar_lea.sflag (!%p1884_p0), [#allocation3], %s1671_s23  ;;  %s393_s25 = scalar_lea.vmem (!%p1884_p0), [#allocation2], %s1161_s7 }
  0x51   : > { %1449 = dma.done.wait (%p1885_p10), %s390_s3, 512  }
  0x52   : > { %1451 = vsyncadd (%p1885_p10), %s390_s3, 4294966784  ;;  %p1886_p5 = scmp.ne.s32.totalorder %s1870_s22, 0 }
  0x54   : > { %1453 = dma.done.wait (%p1886_p5), [#allocation6], 64  }
  0x55   : > { %1455 = vsyncadd (%p1886_p5), [#allocation6], 4294967232  ;;  %p448_p3 = scmp.lt.s32.totalorder %s1474_s16, 1  ;;  %v1489_v0 = vmov 0.0   ;;  %v1490_v1 = vmov 0   ;;  %v1692_v2 = vld [vmem:[%s393_s25 + $0x18] sm:$0xff] }
  0x56   : > { %537 = vmatprep.mubr.f32.mxu0 %v1489_v0  ;;  %611 = vmatprep.mubr.f32.mxu1 %v1489_v0  ;;  %v1696_v4 = vld [vmem:[%s393_s25 + $0x10] sm:$0xff]  ;;  %v1702_v6 = vld [vmem:[%s393_s25 + $0x8] sm:$0xff]  ;;  %v1708_v8 = vld [vmem:[%s393_s25] sm:$0xff]  ;;  %vm469_vm0 = vcmask 130048   ;;  %vm669_vm1 = vcmask 1041408   ;;  %vm656_vm2 = vcmask 15360  }
  0x57   : > { %s449_s26 = scalar_select %p448_p3, %s1474_s16, 1  ;;  %1284 = vset.pattern.permute.xlu0 %v1490_v1  ;;  %1285 = vset.pattern.permute.xlu1 %v1490_v1  ;;  %v464_v10 = vld [vmem:[#allocation7] sm:$0x3]  ;;  %v459_v11 = vld [vmem:[#allocation5] sm:$0x3]  ;;  %v635_v13 = vld [vmem:[%s1845_s6 + $0x18] sm:$0xff] }
  0x58   : > { %501 = vmatprep.subr.mxu0 %v1692_v2  ;;  %v618_v12 = vld [vmem:[%s1843_s4] sm:$0x3]  ;;  %v992_v15 = vld [vmem:[%s1848_s9 + $0x8] sm:$0xff]  ;;  %v634_v16 = vld [vmem:[%s1845_s6 + $0x10] sm:$0xff]  ;;  %s1888_s11 = sld [smem:[#allocation14_spill]]  ;;  %s1194_s19 = sshll.u32 %s1474_s16, 9 }
  0x59   : > { %s1193_s24 = sshll.u32 %s449_s26, 5  ;;  %502 = vmatpush1.msra.mxu0 %v1696_v4  ;;  %621 = vperm.xlu0 %1284, %v618_v12   ;;  %v632_v14 = vld [vmem:[%s1845_s6] sm:$0xff]  ;;  %v633_v17 = vld [vmem:[%s1845_s6 + $0x8] sm:$0xff]  ;;  %v630_v32 = vld [vmem:[%s1844_s5 + $0x10] sm:$0xff]  ;;  %s1889_s20 = sld [smem:[#allocation19_spill]] }
  0x5a   : > { %s455_s28 = scalar_lea.vmem %s1839_s0, %s1193_s24  ;;  %503 = vmatprep.subr.mxu0 %v1702_v6  ;;  %648 = vperm.xlu1 %1285, %v634_v16   ;;  %v991_v18 = vld [vmem:[%s1848_s9] sm:$0xff]  ;;  %v629_v31 = vld [vmem:[%s1844_s5 + $0x8] sm:$0xff]  ;;  %v631_v33 = vld [vmem:[%s1844_s5 + $0x18] sm:$0xff]  ;;  %s1887_s24 = sld [smem:[#allocation18_spill]] }
  0x5b   : > { %v1694_v3 = vld [vmem:[%s455_s28 + $0x18] sm:$0xff]  ;;  %v1700_v5 = vld [vmem:[%s455_s28 + $0x10] sm:$0xff]  ;;  %v1704_v7 = vld [vmem:[%s455_s28 + $0x8] sm:$0xff]  ;;  %504 = vmatpush1.msra.mxu0 %v1708_v8  ;;  %s1012_s2 = scalar_lea.sflag [#allocation4], %s1671_s23  ;;  %s1491_s18 = smov [#allocation8]  }
  0x5c   : > { %575 = vmatprep.subr.mxu1 %v1694_v3  ;;  %v1710_v9 = vld [vmem:[%s455_s28] sm:$0xff]  ;;  %1167 = vmatmul.mubr.msk.f32.vlgmr.msra.gmra.mxu0 %vm469_vm0, %v464_v10  ;;  %s446_s28 = scalar_lea.vmem [#allocation8], %s1161_s7  ;;  %s1402_s13 = sshll.u32 %s1491_s18, 4  ;;  %s1403_s13 = int_to_ptr.vmem [resolvable:$false] %s1402_s13 }
  0x5d   : > { %576 = vmatpush1.msra.mxu1 %v1700_v5  ;;  %740 = vmatprep.mubr.f32.mxu0 %v1489_v0  ;;  %v628_v30 = vld [vmem:[%s1844_s5] sm:$0xff]  ;;  %s1027_s22 = sshll.u32 %s446_s28, 4  ;;  %s1404_s3 = scalar_lea.vmem %s1403_s13, 1024  ;;  %s1786_s22 = int_to_ptr.vmem [resolvable:$true] %s1027_s22 }
  0x5e   : > { %577 = vmatprep.subr.mxu1 %v1704_v7  ;;  %653 = vperm.xlu0 %1284, %v635_v13   ;;  %s1398_s16 = scalar_lea.vmem %s1786_s22, 512  ;;  %p1890_p8 = scmp.ne.s32.totalorder %s1888_s11, 0 }
  0x5f   : > { %578 = vmatpush1.msra.mxu1 %v1710_v9  ;;  %643 = vperm.xlu1 %1285, %v633_v17   ;;  %s1791_s12 = scalar_lea.hbm %s1889_s20, %s1194_s19  ;;  %p1399_p7 = scmp.ne.s32.totalorder %s1786_s22, %s1398_s16 }
  0x60   : > { %1168 = vmatmul.mubr.msk.f32.vlgmr.msra.gmra.mxu1 %vm469_vm0, %v459_v11  ;;  %p1405_p13 = scmp.lt.s32.totalorder %s1786_s22, %s1403_s13  ;;  %p1406_p4 = scmp.lt.s32.totalorder %s1404_s3, %s1398_s16 }
  0x61   : > { %895 = vmatprep.mubr.f32.mxu1 %v1489_v0  ;;  %p1400_p9 = pnand %p1399_p7, %p1890_p8 }
  0x62   : > { %638 = vperm.xlu0 %1284, %v632_v14   ;;  %p1407_p2 = por %p1406_p4, %p1405_p13 }
  0x63   : > { %995 = vperm.xlu1 %1285, %v991_v18   ;;  %p1401_p12 = pneg %p1400_p9 }
  0x65   : > { %p1408_p6 = pnand %p1407_p2, %p1401_p12 }
  0x66   : > { %1000 = vperm.xlu0 %1284, %v992_v15  }
  0xd4   : > { %v622_v24 = vpop.permute.xlu0 %621 }
  0xd5   : > { %v649_v36 = vpop.permute.xlu1 %648 }
  0xd9   : > { %v654_v34 = vpop.permute.xlu0 %653 }
  0xda   : > { %v644_v41 = vpop.permute.xlu1 %643 }
  0xdd   : > { %v639_v38 = vpop.permute.xlu0 %638 }
 0x11c   : > { %v539_v19 = vpop.f32.mrf.mxu0 }
 0x11e   : > { %v541_v22 = vpop.f32.mrf.mxu0 }
 0x120   : > { %v613_v20 = vpop.f32.mrf.mxu1 }
 0x121   : > { %v614_v21 = vadd.f32 %v613_v20, %v539_v19 }
 0x122   : > { %v615_v23 = vpop.f32.mrf.mxu1 }
 0x123   : > { %v616_v25 = vadd.f32 %v615_v23, %v541_v22  ;;  %v624_v26 = vadd.f32 %v622_v24, %v614_v21 }
 0x125   : > { %v625_v27 = vadd.f32 %v622_v24, %v616_v25  ;;  %v626_v29 = vmax.f32 %v624_v26, 0.0 }
 0x127   : > { %v627_v28 = vmax.f32 %v625_v27, 0.0 }
 0x129   : > { %1169 = vmatprep.subr.msk.mxu0 %vm669_vm1, %v627_v28 }
 0x12a   : > { %1170 = vmatpush1.msk.msra.mxu0 %vm669_vm1, %v626_v29 }
 0x12b   : > { %1171 = vmatmul.mubr.msk.f32.vlgmr.msra.gmra.mxu0 %vm656_vm2, %v628_v30 }
 0x12c   : > { %746 = vmatprep.mubr.f32.mxu0 %v1489_v0 }
 0x12f   : > { %1172 = vmatmul.mubr.msk.f32.gmra.mxu0 %vm656_vm2, %v629_v31 }
 0x130   : > { %752 = vmatprep.mubr.f32.mxu0 %v1489_v0 }
 0x133   : > { %1173 = vmatmul.mubr.msk.f32.gmra.mxu0 %vm656_vm2, %v630_v32 }
 0x134   : > { %758 = vmatprep.mubr.f32.mxu0 %v1489_v0 }
 0x137   : > { %1174 = vmatmul.mubr.msk.f32.gmra.mxu0 %vm656_vm2, %v631_v33 }
 0x1eb   : > { %v742_v35 = vpop.f32.mrf.mxu0 }
 0x1ec   : > { %v743_v51 = vadd.f32 %v742_v35, %v639_v38 }
 0x1ed   : > { %v744_v37 = vpop.f32.mrf.mxu0 }
 0x1ee   : > { %v745_v40 = vadd.f32 %v744_v37, %v639_v38  ;;  %v1175_v60 = vmul.f32 -1.442695, %v743_v51 }
 0x1ef   : > { %v748_v39 = vpop.f32.mrf.mxu0 }
 0x1f0   : > { %v1176_v45 = vmul.f32 -1.442695, %v745_v40  ;;  %v749_v47 = vadd.f32 %v748_v39, %v644_v41 }
 0x1f1   : > { %v750_v42 = vpop.f32.mrf.mxu0 }
 0x1f2   : > { %v751_v43 = vadd.f32 %v750_v42, %v644_v41  ;;  %1286 = vpow2.f32 %v1176_v45  ;;  %v1177_v56 = vmul.f32 -1.442695, %v749_v47  ;;  %v996_v41 = vpop.permute.xlu1 %995  ;;  %v1001_v47 = vpop.permute.xlu0 %1000 }
 0x1f3   : > { %v754_v44 = vpop.f32.mrf.mxu0 }
 0x1f4   : > { %v755_v46 = vadd.f32 %v754_v44, %v649_v36  ;;  %v1178_v48 = vmul.f32 -1.442695, %v751_v43 }
 0x1f5   : > { %v756_v49 = vpop.f32.mrf.mxu0 }
 0x1f6   : > { %v757_v50 = vadd.f32 %v756_v49, %v649_v36  ;;  %v1179_v52 = vmul.f32 -1.442695, %v755_v46  ;;  %1288 = vpow2.f32 %v1178_v48 }
 0x1f7   : > { %v760_v53 = vpop.f32.mrf.mxu0 }
 0x1f8   : > { %v1180_v54 = vmul.f32 -1.442695, %v757_v50  ;;  %v761_v55 = vadd.f32 %v760_v53, %v654_v34 }
 0x1f9   : > { %v762_v57 = vpop.f32.mrf.mxu0 }
 0x1fa   : > { %1290 = vpow2.f32 %v1180_v54  ;;  %v1181_v58 = vmul.f32 -1.442695, %v761_v55  ;;  %v763_v59 = vadd.f32 %v762_v57, %v654_v34  ;;  %v823_v34 = vld [vmem:[%s1847_s8] sm:$0xff] }
 0x1fb   : > { %1292 = vpow2.f32 %v1179_v52 }
 0x1fc   : > { %1294 = vpow2.f32 %v1181_v58  ;;  %v1182_v61 = vmul.f32 -1.442695, %v763_v59 }
 0x1fd   : > { %1296 = vpow2.f32 %v1177_v56 }
 0x1fe   : > { %1298 = vpow2.f32 %v1182_v61 }
 0x1ff   : > { %1300 = vpow2.f32 %v1175_v60  ;;  %v1287_v62 = vpop.eup %1286 }
 0x200   : > { %v790_v21 = vadd.f32 1.0, %v1287_v62 }
 0x203   : > { %v1289_v63 = vpop.eup %1288 }
 0x204   : > { %v792_v18 = vadd.f32 1.0, %v1289_v63 }
 0x207   : > { %v1291_v1 = vpop.eup %1290 }
 0x208   : > { %v1293_v10 = vpop.eup %1292  ;;  %v794_v11 = vadd.f32 1.0, %v1291_v1 }
 0x209   : > { %v1295_v12 = vpop.eup %1294  ;;  %v793_v16 = vadd.f32 1.0, %v1293_v10 }
 0x20a   : > { %v1297_v13 = vpop.eup %1296  ;;  %v795_v14 = vadd.f32 1.0, %v1295_v12  ;;  %1302 = vrcp.f32 %v794_v11 }
 0x20b   : > { %v1299_v15 = vpop.eup %1298  ;;  %v791_v20 = vadd.f32 1.0, %v1297_v13 }
 0x20c   : > { %v1301_v17 = vpop.eup %1300  ;;  %v796_v19 = vadd.f32 1.0, %v1299_v15  ;;  %1304 = vrcp.f32 %v795_v14 }
 0x20d   : > { %v789_v22 = vadd.f32 1.0, %v1301_v17 }
 0x20e   : > { %1306 = vrcp.f32 %v796_v19 }
 0x20f   : > { %1308 = vrcp.f32 %v793_v16 }
 0x210   : > { %1310 = vrcp.f32 %v792_v18 }
 0x211   : > { %1312 = vrcp.f32 %v791_v20 }
 0x212   : > { %1314 = vrcp.f32 %v790_v21 }
 0x213   : > { %1316 = vrcp.f32 %v789_v22 }
 0x217   : > { %v1303_v23 = vpop.eup %1302 }
 0x218   : > { %v818_v31 = vmul.f32 %v1303_v23, %v1702_v6 }
 0x219   : > { %v1305_v24 = vpop.eup %1304 }
 0x21a   : > { %v819_v29 = vmul.f32 %v1305_v24, %v1696_v4 }
 0x21b   : > { %v1307_v25 = vpop.eup %1306 }
 0x21c   : > { %v1309_v26 = vpop.eup %1308  ;;  %v820_v27 = vmul.f32 %v1307_v25, %v1692_v2 }
 0x21d   : > { %v1311_v28 = vpop.eup %1310  ;;  %v817_v33 = vmul.f32 %v1309_v26, %v1708_v8  ;;  %v824_v8 = vld [vmem:[%s1847_s8 + $0x8] sm:$0xff] }
 0x21e   : > { %v1313_v30 = vpop.eup %1312  ;;  %859 = vmatprep.subr.mxu1 %v820_v27  ;;  %v816_v36 = vmul.f32 %v1311_v28, %v1694_v3  ;;  %v821_v3 = vld [vmem:[%s1887_s24] sm:$0xff] }
 0x21f   : > { %v1315_v32 = vpop.eup %1314  ;;  %860 = vmatpush1.msra.mxu1 %v819_v29  ;;  %v815_v2 = vmul.f32 %v1313_v30, %v1700_v5  ;;  %v822_v5 = vld [vmem:[%s1887_s24 + $0x8] sm:$0xff] }
 0x220   : > { %v1317_v35 = vpop.eup %1316  ;;  %861 = vmatprep.subr.mxu1 %v818_v31  ;;  %v814_v4 = vmul.f32 %v1315_v32, %v1704_v7 }
 0x221   : > { %862 = vmatpush1.msra.mxu1 %v817_v33  ;;  %v813_v6 = vmul.f32 %v1317_v35, %v1710_v9 }
 0x222   : > { %1183 = vmatmul.mubr.msk.f32.vlgmr.msra.gmra.mxu1 %vm469_vm0, %v823_v34  ;;  %942 = vmatprep.subr.mxu1 %v816_v36 }
 0x223   : > { %943 = vmatpush1.msra.mxu1 %v815_v2  ;;  %901 = vmatprep.mubr.f32.mxu1 %v1489_v0 }
 0x224   : > { %944 = vmatprep.subr.mxu1 %v814_v4 }
 0x225   : > { %945 = vmatpush1.msra.mxu1 %v813_v6 }
 0x226   : > { %1184 = vmatmul.mubr.msk.f32.gmra.mxu1 %vm469_vm0, %v824_v8 }
 0x227   : > { %978 = vmatprep.mubr.f32.mxu1 %v1489_v0 }
 0x22a   : > { %1185 = vmatmul.mubr.msk.f32.vlgmr.msra.gmra.mxu1 %vm469_vm0, %v821_v3 }
 0x22b   : > { %984 = vmatprep.mubr.f32.mxu1 %v1489_v0 }
 0x22e   : > { %1186 = vmatmul.mubr.msk.f32.gmra.mxu1 %vm469_vm0, %v822_v5 }
 0x2e2   : > { %v897_v7 = vpop.f32.mrf.mxu1 }
 0x2e4   : > { %v899_v9 = vpop.f32.mrf.mxu1 }
 0x2e6   : > { %v903_v37 = vpop.f32.mrf.mxu1 }
 0x2e8   : > { %v905_v38 = vpop.f32.mrf.mxu1 }
 0x2ea   : > { %v980_v39 = vpop.f32.mrf.mxu1 }
 0x2eb   : > { %v981_v40 = vadd.f32 %v980_v39, %v897_v7 }
 0x2ec   : > { %v982_v42 = vpop.f32.mrf.mxu1 }
 0x2ed   : > { %v1003_v43 = vadd.f32 %v996_v41, %v981_v40  ;;  %v983_v44 = vadd.f32 %v982_v42, %v899_v9 }
 0x2ee   : > { %v986_v0 = vpop.f32.mrf.mxu1 }
 0x2ef   : > { %1007 = vst [vmem:[%s446_s28] sm:$0xff] %v1003_v43  ;;  %v1004_v45 = vadd.f32 %v996_v41, %v983_v44  ;;  %v987_v46 = vadd.f32 %v986_v0, %v903_v37 }
 0x2f0   : > { %v988_v48 = vpop.f32.mrf.mxu1 }
 0x2f1   : > { %1008 = vst [vmem:[%s446_s28 + $0x8] sm:$0xff] %v1004_v45  ;;  %v1005_v49 = vadd.f32 %v1001_v47, %v987_v46  ;;  %v989_v50 = vadd.f32 %v988_v48, %v905_v38 }
 0x2f3   : > { %1009 = vst [vmem:[%s446_s28 + $0x10] sm:$0xff] %v1005_v49  ;;  %v1006_v51 = vadd.f32 %v1001_v47, %v989_v50 }
 0x2f5   : > { %1010 = vst [vmem:[%s446_s28 + $0x18] sm:$0xff] %v1006_v51 }
 0x2f6   : > { %1411 = shalt.err (!%p1408_p6)
}
 0x2f7   : > { %s1412_s25 = scalar_lea.hbm %s1791_s12, 512  ;;  %s1416_s30 = scalar_lea.hbm %s1889_s20, 1024 }
 0x2f8   : > { %p1413_p11 = scmp.ne.s32.totalorder %s1791_s12, %s1412_s25  ;;  %p1417_p10 = scmp.lt.s32.totalorder %s1791_s12, %s1889_s20 }
 0x2f9   : > { %p1418_p5 = scmp.lt.s32.totalorder %s1416_s30, %s1412_s25 }
 0x2fa   : > { %p1414_p1 = pnand %p1413_p11, %p1890_p8 }
 0x2fb   : > { %p1419_p3 = por %p1418_p5, %p1417_p10 }
 0x2fc   : > { %p1415_p0 = pneg %p1414_p1 }
 0x2fe   : > { %p1420_p7 = pnand %p1419_p3, %p1415_p0 }
 0x300   : > { %1423 = shalt.err (!%p1420_p7)
}
 0x301   : > { %s1492_s21 = smov 256   ;;  %s1493_s7 = smov 16  }
 0x302   : > { %1205 = dma.vmem_to_hbm [thread:$0]  (%p1890_p8), %s1786_s22, 512, %s1791_s12, %s1012_s2, %s1492_s21, %s1492_s21, %s1493_s7  }
 0x303 PF: > { %s1891_s16 = sld [smem:[#allocation12_spill]] }
 0x304   : > { %s1892_s18 = sld [smem:[#allocation15_spill]] }
 0x305   : > { %s1893_s13 = sld [smem:[#allocation13_spill]] }
 0x309   : > { %s1042_s3 = sand.u32 1, %s1891_s16  }
 0x30a   : > { %p1894_p9 = scmp.ne.s32.totalorder %s1892_s18, 0  ;;  %s1043_s25 = scalar_lea.sflag [#allocation4], %s1042_s3 }
 0x30b   : > { %p1895_p12 = scmp.ge.s32.totalorder %s1893_s13, 2 }
 0x30d   : > { %p1219_p13 = pnand %p1895_p12, %p1894_p9 }
 0x30f   : > { %p1220_p4 = pneg %p1219_p13 }
 0x311   : > { %1457 = dma.done.wait (%p1220_p4), %s1043_s25, 512  }
 0x312   : > { %1459 = vsyncadd (%p1220_p4), %s1043_s25, 4294966784  ;;  %s27_s18 = sadd.s32 1, %s1893_s13   ;;  %s1896_s13 = smov %s1466_s14 }
 0x313   : > { %p24_p2 = scmp.ge.s32.totalorder %s27_s18, 4   ;;  %s1897_s14 = smov %s1470_s15 }
 0x314   : > { %s1898_s15 = smov %s1662_s10  ;;  %s1899_s16 = smov %s1478_s17 }
 0x315   : > { %s1900_s17 = smov %s1902_s29  ;;  %26 = sbr.rel (!%p24_p2) target bundleno = 12 (0xc), region = 116 }
 0x31a   :  { %1048 = vsyncpa [#allocation3], 1 }
 0x31b   :  { %1050 = vsyncpa [#allocation3 + $0x1], 1 }
 0x31c   :  { %1051 = vsyncpa [#allocation6], 1 }
 0x31d   :  { %1052 = vsyncpa [#allocation4], 1 }
 0x31e   :  { %1054 = vsyncpa [#allocation4 + $0x1], 1 }

// kernel: tpu_custom_call.1
= control target key start
LH: loop header
LB: loop body
LE: loop exit
PB: predicated region body
PF: predicated region fallthrough
CT: control target
= control target key end

     0   :  { %s1839_s0 = inlined_call_operand.vmem [shape: f32[2,16,256], index: 0, kind: input, shape index: {}]   ;;  %s1840_s1 = inlined_call_operand.hbm [shape: f32[2,16,256], index: 1, kind: input, shape index: {}]   ;;  %s1841_s2 = inlined_call_operand.hbm [shape: f32[2,16], index: 2, kind: input, shape index: {}]   ;;  %s1842_s3 = inlined_call_operand.hbm [shape: f32[2,16], index: 3, kind: input, shape index: {}]   ;;  %s1843_s4 = inlined_call_operand.vmem [shape: f32[2,1], index: 4, kind: input, shape index: {}]   ;;  %s1844_s5 = inlined_call_operand.vmem [shape: f32[32,2], index: 5, kind: input, shape index: {}]   ;;  %s1845_s6 = inlined_call_operand.vmem [shape: f32[32,1], index: 6, kind: input, shape index: {}]   ;;  %s1846_s7 = inlined_call_operand.vmem [shape: f32[16,16], index: 7, kind: input, shape index: {}]   ;;  %s1847_s8 = inlined_call_operand.vmem [shape: f32[16,16], index: 8, kind: input, shape index: {}]   ;;  %s1848_s9 = inlined_call_operand.vmem [shape: f32[16,1], index: 9, kind: input, shape index: {}]   ;;  %s1849_s10 = inlined_call_operand.hbm [shape: f32[2,16,256], index: 10, kind: output, shape index: {}]  }
   0x1   :  { %1864 = sst [smem:[#allocation16_spill]] %s1841_s2 }
   0x2   :  { %1865 = sst [smem:[#allocation17_spill]] %s1842_s3 }
   0x3   :  { %1866 = sst [smem:[#allocation18_spill]] %s1846_s7 }
   0x4   :  { %1867 = sst [smem:[#allocation19_spill]] %s1849_s10 }
   0x5   :  { %15 = vsyncpa [#allocation3], 0 }
   0x6   :  { %17 = vsyncpa [#allocation3 + $0x1], 0 }
   0x7   :  { %18 = vsyncpa [#allocation6], 0 }
   0x8   :  { %19 = vsyncpa [#allocation4], 0 }
   0x9   :  { %21 = vsyncpa [#allocation4 + $0x1], 0  ;;  %s1549_s13 = smov 0   ;;  %s1551_s14 = smov 0  }
   0xa   :  { %s1553_s15 = smov 0   ;;  %s1555_s16 = smov 0  }
   0xb   :  { %s1557_s17 = smov 0   ;;  %s1559_s18 = smov 0  }
   0xc LB: > { %1868 = sst [smem:[#allocation12_spill]] %s1462_s13  ;;  %s1151_s19 = sadd.s32 4294967295, %s1482_s18   ;;  %s1482_s18 = sphi %s1559_s18, %s27_s18   ;;  %s1478_s17 = sphi %s1557_s17, %s1900_s17   ;;  %s1474_s16 = sphi %s1555_s16, %s1899_s16   ;;  %s1470_s15 = sphi %s1553_s15, %s1898_s15   ;;  %s1466_s14 = sphi %s1551_s14, %s1897_s14   ;;  %s1462_s13 = sphi %s1549_s13, %s1896_s13  }
   0xd   : > { %1869 = sst [smem:[#allocation13_spill]] %s1482_s18  ;;  %s1152_s20 = sadd.s32 4294967294, %s1482_s18  }
   0xe   : > { %p83_p0 = scmp.ne.s32.totalorder %s1470_s15, %s1466_s14  ;;  %p84_p1 = scmp.eq.s32.totalorder %s1482_s18, 0 }
   0xf   : > { %p89_p2 = scmp.ne.s32.totalorder %s1466_s14, %s1462_s13  ;;  %p1587_p3 = scmp.eq.s32.totalorder %s1151_s19, 0 }
  0x10   : > { %p283_p4 = scmp.eq.s32.totalorder %s1151_s19, 1  ;;  %p1591_p5 = por %p84_p1, %p83_p0 }
  0x11   : > { %s1870_s22 = scalar_select %p1587_p3, 1, 0 }
  0x12   : > { %p289_p6 = scmp.eq.s32.totalorder %s1152_s20, 1  ;;  %p1597_p7 = por %p1587_p3, %p89_p2 }
  0x13   : > { %p1601_p8 = por %p283_p4, %p83_p0  ;;  %p1153_p10 = scmp.ge.s32.totalorder %s1482_s18, 1 }
  0x14   : > { %s1872_s24 = scalar_select %p1597_p7, 1, 0 }
  0x15   : > { %s1873_s25 = scalar_select %p1601_p8, 1, 0 }
  0x16   : > { %p1605_p9 = por %p289_p6, %p89_p2  ;;  %p296_p11 = scmp.lt.s32.totalorder %s1482_s18, 3 }
  0x17   : > { %1874 = sst [smem:[#allocation14_spill]] %s1873_s25  ;;  %s1484_s28 = smov [#allocation5]  }
  0x18   : > { %s1875_s26 = scalar_select %p1605_p9, 1, 0 }
  0x19   : > { %p1612_p13 = pnand %p1153_p10, %p296_p11  ;;  %s309_s29 = sshll.u32 %s1484_s28, 4  ;;  %s310_s29 = int_to_ptr.vmem [resolvable:$true] %s309_s29 }
  0x1a   : > { %1876 = sst [smem:[#allocation15_spill]] %s1875_s26  ;;  %p1224_p1 = scmp.lt.s32.totalorder %s1482_s18, 2 }
  0x1b   : > { %s1877_s27 = scalar_select %p1612_p13, 1, 0 }
  0x1c   : > { %p1207_p0 = pneg %p1612_p13  ;;  %p1621_p4 = pnand %p1224_p1, %p1591_p5 }
  0x1d   : > { %s1485_s11 = smov [#allocation7]   ;;  %s1329_s20 = scalar_lea.vmem %s310_s29, 32 }
  0x1e   : > { %s1878_s30 = scalar_select %p1621_p4, 1, 0 }
  0x1f   : > { %s320_s12 = sshll.u32 %s1485_s11, 4  ;;  %p1627_p2 = pnand %p1207_p0, %p1587_p3  ;;  %s321_s12 = int_to_ptr.vmem [resolvable:$true] %s320_s12 }
  0x20   : > { %p1330_p10 = scmp.ne.s32.totalorder %s310_s29, %s1329_s20  ;;  %p1337_p1 = scmp.lt.s32.totalorder %s310_s29, %s310_s29 }
  0x21   : > { %p1320_p6 = pneg %p1627_p2  ;;  %p1338_p12 = scmp.lt.s32.totalorder %s1329_s20, %s1329_s20 }
  0x23   : > { %p1332_p5 = pnand %p1330_p10, %p1320_p6  ;;  %p1339_p9 = por %p1338_p12, %p1337_p1 }
  0x25   : > { %p1333_p11 = pneg %p1332_p5 }
  0x27   : > { %p1340_p8 = pnand %p1339_p9, %p1333_p11 }
  0x29   : > { %1343 = shalt.err (!%p1340_p8)
}
  0x2a   : > { %s1880_s2 = sld [smem:[#allocation16_spill]]  ;;  %s1355_s11 = scalar_lea.vmem %s321_s12, 32 }
  0x2b   : > { %p1356_p0 = scmp.ne.s32.totalorder %s321_s12, %s1355_s11  ;;  %p1363_p10 = scmp.lt.s32.totalorder %s321_s12, %s321_s12 }
  0x2c   : > { %p1364_p5 = scmp.lt.s32.totalorder %s1355_s11, %s1355_s11 }
  0x2d   : > { %p1358_p3 = pnand %p1356_p0, %p1320_p6 }
  0x2e   : > { %p1365_p13 = por %p1364_p5, %p1363_p10 }
  0x2f   : > { %p1359_p7 = pneg %p1358_p3 }
  0x30   : > { %1210 = dma.hbm_to_vmem [thread:$0]  (!%p1627_p2), %s1880_s2, 32, %s310_s29, [#allocation6]  }
  0x31   : > { %p1366_p4 = pnand %p1365_p13, %p1359_p7 }
  0x33   : > { %1369 = shalt.err (!%p1366_p4)
}
  0x34   : > { %s1881_s3 = sld [smem:[#allocation17_spill]]  ;;  %s39_s29 = sadd.s32 1, %s1478_s17 }
  0x35   : > { %s362_s23 = sand.u32 1, %s1470_s15   ;;  %p41_p3 = scmp.ge.s32.totalorder %s39_s29, 2 }
  0x36   : > { %s1157_s28 = sshll.u32 %s362_s23, 5  ;;  %s1192_s11 = sshll.u32 %s1478_s17, 9 }
  0x37   : > { %s1902_s29 = smov (%p41_p3, %s39_s29), 0  ;;  %s374_s21 = scalar_lea.hbm %s1840_s1, %s1192_s11 }
  0x38   : > { %s71_s20 = ssub.s32 %s1478_s17, %s1902_s29  ;;  %s366_s18 = scalar_lea.vmem [#allocation2], %s1157_s28 }
  0x39   : > { %s375_s26 = sshll.u32 %s366_s18, 4  ;;  %p74_p7 = scmp.eq.s32.totalorder %s71_s20, 0  ;;  %s376_s26 = int_to_ptr.vmem [resolvable:$true] %s375_s26 }
  0x3a   : > { %1213 = dma.hbm_to_vmem [thread:$0]  (!%p1627_p2), %s1881_s3, 32, %s321_s12, [#allocation6]  }
  0x3b   : > { %s1882_s13 = sadd.s32 1, %s1470_s15  ;;  %s363_s12 = scalar_lea.sflag [#allocation3], %s362_s23 }
  0x3c   : > { %s1662_s10 = scalar_select %p74_p7, %s1470_s15, %s1882_s13  }
  0x3d   : > { %p1883_p8 = scmp.ne.s32.totalorder %s1878_s30, 0  ;;  %s1383_s3 = scalar_lea.vmem %s376_s26, 512 }
  0x3e   : > { %p1384_p12 = scmp.ne.s32.totalorder %s376_s26, %s1383_s3  ;;  %s1486_s25 = smov [#allocation2]  }
  0x3f   : > { %p1372_p9 = pneg %p1883_p8  ;;  %s1388_s7 = sshll.u32 %s1486_s25, 4  ;;  %s1389_s7 = int_to_ptr.vmem [resolvable:$false] %s1388_s7 }
  0x40   : > { %s1390_s2 = scalar_lea.vmem %s1389_s7, 1024  ;;  %p1391_p2 = scmp.lt.s32.totalorder %s376_s26, %s1389_s7 }
  0x41   : > { %p1386_p13 = pnand %p1384_p12, %p1372_p9  ;;  %p1392_p6 = scmp.lt.s32.totalorder %s1390_s2, %s1383_s3 }
  0x43   : > { %p1387_p4 = pneg %p1386_p13  ;;  %p1393_p11 = por %p1392_p6, %p1391_p2 }
  0x45   : > { %p1394_p1 = pnand %p1393_p11, %p1387_p4 }
  0x47   : > { %1397 = shalt.err (!%p1394_p1)
}
  0x48   : > { %s1487_s18 = smov 256   ;;  %s1488_s13 = smov 16  }
  0x49   : > { %1217 = dma.hbm_to_vmem [thread:$0]  (!%p1883_p8), %s374_s21, 512, %s376_s26, %s363_s12, %s1487_s18, %s1487_s18, %s1488_s13  }
  0x4a   : > { %p1884_p0 = scmp.ne.s32.totalorder %s1877_s27, 0 }
  0x4b   : > { %s1671_s23 = sand.u32 (!%p1884_p0), 1, %s1466_s14   ;;  %p1885_p10 = scmp.ne.s32.totalorder (!%p1884_p0), %s1872_s24, 0 }
  0x4c   : > { %387 = sbr.rel (%p1884_p0) target bundleno = 771 (0x303), region = 60  ;;  %s1161_s7 = sshll.u32 (!%p1884_p0), %s1671_s23, 5 }
  0x4d   : > { %s390_s3 = scalar_lea.sflag (!%p1884_p0), [#allocation3], %s1671_s23  ;;  %s393_s25 = scalar_lea.vmem (!%p1884_p0), [#allocation2], %s1161_s7 }
  0x51   : > { %1449 = dma.done.wait (%p1885_p10), %s390_s3, 512  }
  0x52   : > { %1451 = vsyncadd (%p1885_p10), %s390_s3, 4294966784  ;;  %p1886_p5 = scmp.ne.s32.totalorder %s1870_s22, 0 }
  0x54   : > { %1453 = dma.done.wait (%p1886_p5), [#allocation6], 64  }
  0x55   : > { %1455 = vsyncadd (%p1886_p5), [#allocation6], 4294967232  ;;  %p448_p3 = scmp.lt.s32.totalorder %s1474_s16, 1  ;;  %v1489_v0 = vmov 0.0   ;;  %v1490_v1 = vmov 0   ;;  %v1692_v2 = vld [vmem:[%s393_s25 + $0x18] sm:$0xff] }
  0x56   : > { %537 = vmatprep.mubr.f32.mxu0 %v1489_v0  ;;  %611 = vmatprep.mubr.f32.mxu1 %v1489_v0  ;;  %v1696_v4 = vld [vmem:[%s393_s25 + $0x10] sm:$0xff]  ;;  %v1702_v6 = vld [vmem:[%s393_s25 + $0x8] sm:$0xff]  ;;  %v1708_v8 = vld [vmem:[%s393_s25] sm:$0xff]  ;;  %vm469_vm0 = vcmask 130048   ;;  %vm669_vm1 = vcmask 1041408   ;;  %vm656_vm2 = vcmask 15360  }
  0x57   : > { %s449_s26 = scalar_select %p448_p3, %s1474_s16, 1  ;;  %1284 = vset.pattern.permute.xlu0 %v1490_v1  ;;  %1285 = vset.pattern.permute.xlu1 %v1490_v1  ;;  %v464_v10 = vld [vmem:[#allocation7] sm:$0x3]  ;;  %v459_v11 = vld [vmem:[#allocation5] sm:$0x3]  ;;  %v635_v13 = vld [vmem:[%s1845_s6 + $0x18] sm:$0xff] }
  0x58   : > { %501 = vmatprep.subr.mxu0 %v1692_v2  ;;  %v618_v12 = vld [vmem:[%s1843_s4] sm:$0x3]  ;;  %v992_v15 = vld [vmem:[%s1848_s9 + $0x8] sm:$0xff]  ;;  %v634_v16 = vld [vmem:[%s1845_s6 + $0x10] sm:$0xff]  ;;  %s1888_s11 = sld [smem:[#allocation14_spill]]  ;;  %s1194_s19 = sshll.u32 %s1474_s16, 9 }
  0x59   : > { %s1193_s24 = sshll.u32 %s449_s26, 5  ;;  %502 = vmatpush1.msra.mxu0 %v1696_v4  ;;  %621 = vperm.xlu0 %1284, %v618_v12   ;;  %v632_v14 = vld [vmem:[%s1845_s6] sm:$0xff]  ;;  %v633_v17 = vld [vmem:[%s1845_s6 + $0x8] sm:$0xff]  ;;  %v630_v32 = vld [vmem:[%s1844_s5 + $0x10] sm:$0xff]  ;;  %s1889_s20 = sld [smem:[#allocation19_spill]] }
  0x5a   : > { %s455_s28 = scalar_lea.vmem %s1839_s0, %s1193_s24  ;;  %503 = vmatprep.subr.mxu0 %v1702_v6  ;;  %648 = vperm.xlu1 %1285, %v634_v16   ;;  %v991_v18 = vld [vmem:[%s1848_s9] sm:$0xff]  ;;  %v629_v31 = vld [vmem:[%s1844_s5 + $0x8] sm:$0xff]  ;;  %v631_v33 = vld [vmem:[%s1844_s5 + $0x18] sm:$0xff]  ;;  %s1887_s24 = sld [smem:[#allocation18_spill]] }
  0x5b   : > { %v1694_v3 = vld [vmem:[%s455_s28 + $0x18] sm:$0xff]  ;;  %v1700_v5 = vld [vmem:[%s455_s28 + $0x10] sm:$0xff]  ;;  %v1704_v7 = vld [vmem:[%s455_s28 + $0x8] sm:$0xff]  ;;  %504 = vmatpush1.msra.mxu0 %v1708_v8  ;;  %s1012_s2 = scalar_lea.sflag [#allocation4], %s1671_s23  ;;  %s1491_s18 = smov [#allocation8]  }
  0x5c   : > { %575 = vmatprep.subr.mxu1 %v1694_v3  ;;  %v1710_v9 = vld [vmem:[%s455_s28] sm:$0xff]  ;;  %1167 = vmatmul.mubr.msk.f32.vlgmr.msra.gmra.mxu0 %vm469_vm0, %v464_v10  ;;  %s446_s28 = scalar_lea.vmem [#allocation8], %s1161_s7  ;;  %s1402_s13 = sshll.u32 %s1491_s18, 4  ;;  %s1403_s13 = int_to_ptr.vmem [resolvable:$false] %s1402_s13 }
  0x5d   : > { %576 = vmatpush1.msra.mxu1 %v1700_v5  ;;  %740 = vmatprep.mubr.f32.mxu0 %v1489_v0  ;;  %v628_v30 = vld [vmem:[%s1844_s5] sm:$0xff]  ;;  %s1027_s22 = sshll.u32 %s446_s28, 4  ;;  %s1404_s3 = scalar_lea.vmem %s1403_s13, 1024  ;;  %s1786_s22 = int_to_ptr.vmem [resolvable:$true] %s1027_s22 }
  0x5e   : > { %577 = vmatprep.subr.mxu1 %v1704_v7  ;;  %653 = vperm.xlu0 %1284, %v635_v13   ;;  %s1398_s16 = scalar_lea.vmem %s1786_s22, 512  ;;  %p1890_p8 = scmp.ne.s32.totalorder %s1888_s11, 0 }
  0x5f   : > { %578 = vmatpush1.msra.mxu1 %v1710_v9  ;;  %643 = vperm.xlu1 %1285, %v633_v17   ;;  %s1791_s12 = scalar_lea.hbm %s1889_s20, %s1194_s19  ;;  %p1399_p7 = scmp.ne.s32.totalorder %s1786_s22, %s1398_s16 }
  0x60   : > { %1168 = vmatmul.mubr.msk.f32.vlgmr.msra.gmra.mxu1 %vm469_vm0, %v459_v11  ;;  %p1405_p13 = scmp.lt.s32.totalorder %s1786_s22, %s1403_s13  ;;  %p1406_p4 = scmp.lt.s32.totalorder %s1404_s3, %s1398_s16 }
  0x61   : > { %895 = vmatprep.mubr.f32.mxu1 %v1489_v0  ;;  %p1400_p9 = pnand %p1399_p7, %p1890_p8 }
  0x62   : > { %638 = vperm.xlu0 %1284, %v632_v14   ;;  %p1407_p2 = por %p1406_p4, %p1405_p13 }
  0x63   : > { %995 = vperm.xlu1 %1285, %v991_v18   ;;  %p1401_p12 = pneg %p1400_p9 }
  0x65   : > { %p1408_p6 = pnand %p1407_p2, %p1401_p12 }
  0x66   : > { %1000 = vperm.xlu0 %1284, %v992_v15  }
  0xd4   : > { %v622_v24 = vpop.permute.xlu0 %621 }
  0xd5   : > { %v649_v36 = vpop.permute.xlu1 %648 }
  0xd9   : > { %v654_v34 = vpop.permute.xlu0 %653 }
  0xda   : > { %v644_v41 = vpop.permute.xlu1 %643 }
  0xdd   : > { %v639_v38 = vpop.permute.xlu0 %638 }
 0x11c   : > { %v539_v19 = vpop.f32.mrf.mxu0 }
 0x11e   : > { %v541_v22 = vpop.f32.mrf.mxu0 }
 0x120   : > { %v613_v20 = vpop.f32.mrf.mxu1 }
 0x121   : > { %v614_v21 = vadd.f32 %v613_v20, %v539_v19 }
 0x122   : > { %v615_v23 = vpop.f32.mrf.mxu1 }
 0x123   : > { %v616_v25 = vadd.f32 %v615_v23, %v541_v22  ;;  %v624_v26 = vadd.f32 %v622_v24, %v614_v21 }
 0x125   : > { %v625_v27 = vadd.f32 %v622_v24, %v616_v25  ;;  %v626_v29 = vmax.f32 %v624_v26, 0.0 }
 0x127   : > { %v627_v28 = vmax.f32 %v625_v27, 0.0 }
 0x129   : > { %1169 = vmatprep.subr.msk.mxu0 %vm669_vm1, %v627_v28 }
 0x12a   : > { %1170 = vmatpush1.msk.msra.mxu0 %vm669_vm1, %v626_v29 }
 0x12b   : > { %1171 = vmatmul.mubr.msk.f32.vlgmr.msra.gmra.mxu0 %vm656_vm2, %v628_v30 }
 0x12c   : > { %746 = vmatprep.mubr.f32.mxu0 %v1489_v0 }
 0x12f   : > { %1172 = vmatmul.mubr.msk.f32.gmra.mxu0 %vm656_vm2, %v629_v31 }
 0x130   : > { %752 = vmatprep.mubr.f32.mxu0 %v1489_v0 }
 0x133   : > { %1173 = vmatmul.mubr.msk.f32.gmra.mxu0 %vm656_vm2, %v630_v32 }
 0x134   : > { %758 = vmatprep.mubr.f32.mxu0 %v1489_v0 }
 0x137   : > { %1174 = vmatmul.mubr.msk.f32.gmra.mxu0 %vm656_vm2, %v631_v33 }
 0x1eb   : > { %v742_v35 = vpop.f32.mrf.mxu0 }
 0x1ec   : > { %v743_v51 = vadd.f32 %v742_v35, %v639_v38 }
 0x1ed   : > { %v744_v37 = vpop.f32.mrf.mxu0 }
 0x1ee   : > { %v745_v40 = vadd.f32 %v744_v37, %v639_v38  ;;  %v1175_v60 = vmul.f32 -1.442695, %v743_v51 }
 0x1ef   : > { %v748_v39 = vpop.f32.mrf.mxu0 }
 0x1f0   : > { %v1176_v45 = vmul.f32 -1.442695, %v745_v40  ;;  %v749_v47 = vadd.f32 %v748_v39, %v644_v41 }
 0x1f1   : > { %v750_v42 = vpop.f32.mrf.mxu0 }
 0x1f2   : > { %v751_v43 = vadd.f32 %v750_v42, %v644_v41  ;;  %1286 = vpow2.f32 %v1176_v45  ;;  %v1177_v56 = vmul.f32 -1.442695, %v749_v47  ;;  %v996_v41 = vpop.permute.xlu1 %995  ;;  %v1001_v47 = vpop.permute.xlu0 %1000 }
 0x1f3   : > { %v754_v44 = vpop.f32.mrf.mxu0 }
 0x1f4   : > { %v755_v46 = vadd.f32 %v754_v44, %v649_v36  ;;  %v1178_v48 = vmul.f32 -1.442695, %v751_v43 }
 0x1f5   : > { %v756_v49 = vpop.f32.mrf.mxu0 }
 0x1f6   : > { %v757_v50 = vadd.f32 %v756_v49, %v649_v36  ;;  %v1179_v52 = vmul.f32 -1.442695, %v755_v46  ;;  %1288 = vpow2.f32 %v1178_v48 }
 0x1f7   : > { %v760_v53 = vpop.f32.mrf.mxu0 }
 0x1f8   : > { %v1180_v54 = vmul.f32 -1.442695, %v757_v50  ;;  %v761_v55 = vadd.f32 %v760_v53, %v654_v34 }
 0x1f9   : > { %v762_v57 = vpop.f32.mrf.mxu0 }
 0x1fa   : > { %1290 = vpow2.f32 %v1180_v54  ;;  %v1181_v58 = vmul.f32 -1.442695, %v761_v55  ;;  %v763_v59 = vadd.f32 %v762_v57, %v654_v34  ;;  %v823_v34 = vld [vmem:[%s1847_s8] sm:$0xff] }
 0x1fb   : > { %1292 = vpow2.f32 %v1179_v52 }
 0x1fc   : > { %1294 = vpow2.f32 %v1181_v58  ;;  %v1182_v61 = vmul.f32 -1.442695, %v763_v59 }
 0x1fd   : > { %1296 = vpow2.f32 %v1177_v56 }
 0x1fe   : > { %1298 = vpow2.f32 %v1182_v61 }
 0x1ff   : > { %1300 = vpow2.f32 %v1175_v60  ;;  %v1287_v62 = vpop.eup %1286 }
 0x200   : > { %v790_v21 = vadd.f32 1.0, %v1287_v62 }
 0x203   : > { %v1289_v63 = vpop.eup %1288 }
 0x204   : > { %v792_v18 = vadd.f32 1.0, %v1289_v63 }
 0x207   : > { %v1291_v1 = vpop.eup %1290 }
 0x208   : > { %v1293_v10 = vpop.eup %1292  ;;  %v794_v11 = vadd.f32 1.0, %v1291_v1 }
 0x209   : > { %v1295_v12 = vpop.eup %1294  ;;  %v793_v16 = vadd.f32 1.0, %v1293_v10 }
 0x20a   : > { %v1297_v13 = vpop.eup %1296  ;;  %v795_v14 = vadd.f32 1.0, %v1295_v12  ;;  %1302 = vrcp.f32 %v794_v11 }
 0x20b   : > { %v1299_v15 = vpop.eup %1298  ;;  %v791_v20 = vadd.f32 1.0, %v1297_v13 }
 0x20c   : > { %v1301_v17 = vpop.eup %1300  ;;  %v796_v19 = vadd.f32 1.0, %v1299_v15  ;;  %1304 = vrcp.f32 %v795_v14 }
 0x20d   : > { %v789_v22 = vadd.f32 1.0, %v1301_v17 }
 0x20e   : > { %1306 = vrcp.f32 %v796_v19 }
 0x20f   : > { %1308 = vrcp.f32 %v793_v16 }
 0x210   : > { %1310 = vrcp.f32 %v792_v18 }
 0x211   : > { %1312 = vrcp.f32 %v791_v20 }
 0x212   : > { %1314 = vrcp.f32 %v790_v21 }
 0x213   : > { %1316 = vrcp.f32 %v789_v22 }
 0x217   : > { %v1303_v23 = vpop.eup %1302 }
 0x218   : > { %v818_v31 = vmul.f32 %v1303_v23, %v1702_v6 }
 0x219   : > { %v1305_v24 = vpop.eup %1304 }
 0x21a   : > { %v819_v29 = vmul.f32 %v1305_v24, %v1696_v4 }
 0x21b   : > { %v1307_v25 = vpop.eup %1306 }
 0x21c   : > { %v1309_v26 = vpop.eup %1308  ;;  %v820_v27 = vmul.f32 %v1307_v25, %v1692_v2 }
 0x21d   : > { %v1311_v28 = vpop.eup %1310  ;;  %v817_v33 = vmul.f32 %v1309_v26, %v1708_v8  ;;  %v824_v8 = vld [vmem:[%s1847_s8 + $0x8] sm:$0xff] }
 0x21e   : > { %v1313_v30 = vpop.eup %1312  ;;  %859 = vmatprep.subr.mxu1 %v820_v27  ;;  %v816_v36 = vmul.f32 %v1311_v28, %v1694_v3  ;;  %v821_v3 = vld [vmem:[%s1887_s24] sm:$0xff] }
 0x21f   : > { %v1315_v32 = vpop.eup %1314  ;;  %860 = vmatpush1.msra.mxu1 %v819_v29  ;;  %v815_v2 = vmul.f32 %v1313_v30, %v1700_v5  ;;  %v822_v5 = vld [vmem:[%s1887_s24 + $0x8] sm:$0xff] }
 0x220   : > { %v1317_v35 = vpop.eup %1316  ;;  %861 = vmatprep.subr.mxu1 %v818_v31  ;;  %v814_v4 = vmul.f32 %v1315_v32, %v1704_v7 }
 0x221   : > { %862 = vmatpush1.msra.mxu1 %v817_v33  ;;  %v813_v6 = vmul.f32 %v1317_v35, %v1710_v9 }
 0x222   : > { %1183 = vmatmul.mubr.msk.f32.vlgmr.msra.gmra.mxu1 %vm469_vm0, %v823_v34  ;;  %942 = vmatprep.subr.mxu1 %v816_v36 }
 0x223   : > { %943 = vmatpush1.msra.mxu1 %v815_v2  ;;  %901 = vmatprep.mubr.f32.mxu1 %v1489_v0 }
 0x224   : > { %944 = vmatprep.subr.mxu1 %v814_v4 }
 0x225   : > { %945 = vmatpush1.msra.mxu1 %v813_v6 }
 0x226   : > { %1184 = vmatmul.mubr.msk.f32.gmra.mxu1 %vm469_vm0, %v824_v8 }
 0x227   : > { %978 = vmatprep.mubr.f32.mxu1 %v1489_v0 }
 0x22a   : > { %1185 = vmatmul.mubr.msk.f32.vlgmr.msra.gmra.mxu1 %vm469_vm0, %v821_v3 }
 0x22b   : > { %984 = vmatprep.mubr.f32.mxu1 %v1489_v0 }
 0x22e   : > { %1186 = vmatmul.mubr.msk.f32.gmra.mxu1 %vm469_vm0, %v822_v5 }
 0x2e2   : > { %v897_v7 = vpop.f32.mrf.mxu1 }
 0x2e4   : > { %v899_v9 = vpop.f32.mrf.mxu1 }
 0x2e6   : > { %v903_v37 = vpop.f32.mrf.mxu1 }
 0x2e8   : > { %v905_v38 = vpop.f32.mrf.mxu1 }
 0x2ea   : > { %v980_v39 = vpop.f32.mrf.mxu1 }
 0x2eb   : > { %v981_v40 = vadd.f32 %v980_v39, %v897_v7 }
 0x2ec   : > { %v982_v42 = vpop.f32.mrf.mxu1 }
 0x2ed   : > { %v1003_v43 = vadd.f32 %v996_v41, %v981_v40  ;;  %v983_v44 = vadd.f32 %v982_v42, %v899_v9 }
 0x2ee   : > { %v986_v0 = vpop.f32.mrf.mxu1 }
 0x2ef   : > { %1007 = vst [vmem:[%s446_s28] sm:$0xff] %v1003_v43  ;;  %v1004_v45 = vadd.f32 %v996_v41, %v983_v44  ;;  %v987_v46 = vadd.f32 %v986_v0, %v903_v37 }
 0x2f0   : > { %v988_v48 = vpop.f32.mrf.mxu1 }
 0x2f1   : > { %1008 = vst [vmem:[%s446_s28 + $0x8] sm:$0xff] %v1004_v45  ;;  %v1005_v49 = vadd.f32 %v1001_v47, %v987_v46  ;;  %v989_v50 = vadd.f32 %v988_v48, %v905_v38 }
 0x2f3   : > { %1009 = vst [vmem:[%s446_s28 + $0x10] sm:$0xff] %v1005_v49  ;;  %v1006_v51 = vadd.f32 %v1001_v47, %v989_v50 }
 0x2f5   : > { %1010 = vst [vmem:[%s446_s28 + $0x18] sm:$0xff] %v1006_v51 }
 0x2f6   : > { %1411 = shalt.err (!%p1408_p6)
}
 0x2f7   : > { %s1412_s25 = scalar_lea.hbm %s1791_s12, 512  ;;  %s1416_s30 = scalar_lea.hbm %s1889_s20, 1024 }
 0x2f8   : > { %p1413_p11 = scmp.ne.s32.totalorder %s1791_s12, %s1412_s25  ;;  %p1417_p10 = scmp.lt.s32.totalorder %s1791_s12, %s1889_s20 }
 0x2f9   : > { %p1418_p5 = scmp.lt.s32.totalorder %s1416_s30, %s1412_s25 }
 0x2fa   : > { %p1414_p1 = pnand %p1413_p11, %p1890_p8 }
 0x2fb   : > { %p1419_p3 = por %p1418_p5, %p1417_p10 }
 0x2fc   : > { %p1415_p0 = pneg %p1414_p1 }
 0x2fe   : > { %p1420_p7 = pnand %p1419_p3, %p1415_p0 }
 0x300   : > { %1423 = shalt.err (!%p1420_p7)
}
 0x301   : > { %s1492_s21 = smov 256   ;;  %s1493_s7 = smov 16  }
 0x302   : > { %1205 = dma.vmem_to_hbm [thread:$0]  (%p1890_p8), %s1786_s22, 512, %s1791_s12, %s1012_s2, %s1492_s21, %s1492_s21, %s1493_s7  }
 0x303 PF: > { %s1891_s16 = sld [smem:[#allocation12_spill]] }
 0x304   : > { %s1892_s18 = sld [smem:[#allocation15_spill]] }
 0x305   : > { %s1893_s13 = sld [smem:[#allocation13_spill]] }
 0x309   : > { %s1042_s3 = sand.u32 1, %s1891_s16  }
 0x30a   : > { %p1894_p9 = scmp.ne.s32.totalorder %s1892_s18, 0  ;;  %s1043_s25 = scalar_lea.sflag [#allocation4], %s1042_s3 }
 0x30b   : > { %p1895_p12 = scmp.ge.s32.totalorder %s1893_s13, 2 }
 0x30d   : > { %p1219_p13 = pnand %p1895_p12, %p1894_p9 }
 0x30f   : > { %p1220_p4 = pneg %p1219_p13 }
 0x311   : > { %1457 = dma.done.wait (%p1220_p4), %s1043_s25, 512  }
 0x312   : > { %1459 = vsyncadd (%p1220_p4), %s1043_s25, 4294966784  ;;  %s27_s18 = sadd.s32 1, %s1893_s13   ;;  %s1896_s13 = smov %s1466_s14 }
 0x313   : > { %p24_p2 = scmp.ge.s32.totalorder %s27_s18, 4   ;;  %s1897_s14 = smov %s1470_s15 }
 0x314   : > { %s1898_s15 = smov %s1662_s10  ;;  %s1899_s16 = smov %s1478_s17 }
 0x315   : > { %s1900_s17 = smov %s1902_s29  ;;  %26 = sbr.rel (!%p24_p2) target bundleno = 12 (0xc), region = 116 }
 0x31a   :  { %1048 = vsyncpa [#allocation3], 1 }
 0x31b   :  { %1050 = vsyncpa [#allocation3 + $0x1], 1 }
 0x31c   :  { %1051 = vsyncpa [#allocation6], 1 }
 0x31d   :  { %1052 = vsyncpa [#allocation4], 1 }
 0x31e   :  { %1054 = vsyncpa [#allocation4 + $0x1], 1 }

</bundles_post_ra>
